<compile_context>
chip_gen: v7x
topology: tpu7x:2x2x1
jax: 0.10.0
libtpu: 0.0.40
codegen_flags: <defaults>
</compile_context>

<pallas_src>
import functools
import math

import jax
import jax.numpy as jnp
from jax.experimental import pallas as pl
from jax.experimental.pallas import tpu as pltpu


_SUB_ROWS = 8  # rows per basis sub-block: one vreg sublane-row per array when in_f <= 128


def _round_up(x, m):
    return ((x + m - 1) // m) * m


def _pack_block(src_ref, pk_ref, *, in_f, coef, grid_vals, spline_order, sub_rows):
    """Fill pk_ref[:, :(coef+1)*in_f] with [SiLU(x) | B_0(x) | ... | B_{coef-1}(x)].

    src_ref : (tile_n, >=in_f) f32 activations (only first in_f columns used)
    pk_ref  : (tile_n, k_pad)  f32 packed-activation scratch

    Bases are computed over `sub_rows`-row sub-blocks so the statically
    unrolled Cox-de-Boor recursion stays within the 64-vreg register file.
    # TODO(synk): for layers with in_f > 128 the per-array vreg count doubles;
    # a feature-axis sub-block would be needed to fully avoid spill there.
    """
    rows = pk_ref.shape[0]
    n_sub = rows // sub_rows
    G = len(grid_vals)  # grid_size + 2*spline_order + 1 knots

    @pl.loop(0, n_sub, unroll=(n_sub <= 8))
    def _(i):
        r = pl.multiple_of(i * sub_rows, sub_rows)
        x = src_ref[pl.ds(r, sub_rows), pl.ds(0, in_f)]

        # ---- base path: SiLU (exp on the EUP, one divide per element) -------
        silu = x * (1.0 / (1.0 + jnp.exp(-x)))
        pk_ref[pl.ds(r, sub_rows), pl.ds(0, in_f)] = silu

        # ---- degree-0 indicators: differences of cumulative comparisons -----
        # b0_j = [g_j <= x < g_{j+1}] = (x>=g_j) - (x>=g_{j+1})
        c = [jnp.where(x >= g, 1.0, 0.0) for g in grid_vals]
        bases = [c[j] - c[j + 1] for j in range(G - 1)]

        # ---- Cox-de-Boor recursion, shared-term rewrite ----------------------
        # new_j = t_j + (b_{j+1} - t_{j+1}),  t_j = (x - g_j) * inv_j * b_j
        # (the right-term denominator of slot j equals the left-term
        #  denominator of slot j+1; knot differences folded into constants).
        s = [x - g for g in grid_vals[:-1]]  # reused by every degree
        for k in range(1, spline_order + 1):
            t = [
                (s[j] * (1.0 / (grid_vals[j + k] - grid_vals[j]))) * bases[j]
                for j in range(len(bases))
            ]
            bases = [t[j] + (bases[j + 1] - t[j + 1]) for j in range(len(bases) - 1)]

        # len(bases) == coef; store each slice (vst slot, otherwise idle).
        for j in range(coef):
            pk_ref[pl.ds(r, sub_rows), pl.ds((1 + j) * in_f, in_f)] = bases[j]


def _kan_fused_kernel(*refs, layer_meta, grid_vals, spline_order, sub_rows):
    """One token tile through ALL KAN layers.

    refs = (x_ref, w_0, ..., w_{L-1}, o_ref, pk_0[, act_0, pk_1, act_1, ...])
    """
    L = len(layer_meta)
    x_ref = refs[0]
    w_refs = refs[1:1 + L]
    o_ref = refs[1 + L]
    scratch = refs[2 + L:]

    pk_refs, act_refs = [], []
    si = 0
    for l in range(L):
        pk_refs.append(scratch[si]); si += 1
        if l < L - 1:
            act_refs.append(scratch[si]); si += 1

    coef = len(grid_vals) - 1 - spline_order

    src_ref = x_ref
    for l, (in_f, out_f, k_pack, k_pad, out_pad) in enumerate(layer_meta):
        pk_ref = pk_refs[l]

        # Zero the K-pad columns (matching weight rows are zero too, but stale
        # VMEM could hold NaNs). Done every step: trivial cost, and correct
        # regardless of how grid steps are sharded across cores.
        if k_pad > k_pack:
            pk_ref[:, pl.ds(k_pack, k_pad - k_pack)] = jnp.zeros(
                (pk_ref.shape[0], k_pad - k_pack), jnp.float32)

        # Build packed activation block [SiLU | B_0 | ... | B_{coef-1}].
        _pack_block(src_ref, pk_ref, in_f=in_f, coef=coef,
                    grid_vals=grid_vals, spline_order=spline_order,
                    sub_rows=sub_rows)

        # One fused MXU matmul per layer against the VMEM-resident weight.
        dst_ref = o_ref if l == L - 1 else act_refs[l]
        dst_ref[...] = jnp.dot(
            pk_ref[...], w_refs[l][...], preferred_element_type=jnp.float32
        ).astype(dst_ref.dtype)
        src_ref = dst_ref


def kan_forward_pallas(x2d, packed_weights, layer_meta, grid_vals, spline_order,
                       tile_n=512):
    """x2d: (N, in_0) f32; packed_weights[l]: (k_pad_l, out_pad_l) f32."""
    N = x2d.shape[0]
    L = len(layer_meta)
    in_0 = layer_meta[0][0]
    out_last = layer_meta[-1][1]
    out_pad_last = layer_meta[-1][4]

    # Token tiling (multiples of the 8-row sub-block).
    n_ru = _round_up(max(N, 1), _SUB_ROWS)
    tile_n = min(_round_up(tile_n, _SUB_ROWS), n_ru)
    # Ensure >= 2 token tiles when there is enough work so v7x's second
    # TensorCore is used (grid axis is "parallel").
    if n_ru >= 256 and n_ru <= tile_n:
        tile_n = _round_up((n_ru + 1) // 2, _SUB_ROWS)
    n_pad = _round_up(n_ru, tile_n)
    if n_pad != N:
        x2d = jnp.pad(x2d, ((0, n_pad - N), (0, 0)))
    n_tiles = n_pad // tile_n

    kernel = functools.partial(
        _kan_fused_kernel,
        layer_meta=tuple(tuple(m) for m in layer_meta),
        grid_vals=tuple(grid_vals),
        spline_order=spline_order,
        sub_rows=_SUB_ROWS,
    )

    in_specs = [pl.BlockSpec((tile_n, in_0), lambda i: (i, 0))]
    for (_in_f, _out_f, _k_pack, k_pad, out_pad) in layer_meta:
        # Full-shape block, constant index_map -> weight stays VMEM-resident.
        in_specs.append(pl.BlockSpec((k_pad, out_pad), lambda i: (0, 0)))

    scratch_shapes = []
    for l, (_in_f, _out_f, _k_pack, k_pad, out_pad) in enumerate(layer_meta):
        scratch_shapes.append(pltpu.VMEM((tile_n, k_pad), jnp.float32))
        if l < L - 1:
            scratch_shapes.append(pltpu.VMEM((tile_n, out_pad), jnp.float32))

    flops = sum(2 * n_pad * k_pad * out_pad
                for (_, _, _, k_pad, out_pad) in layer_meta)
    transcend = n_pad * sum(m[0] for m in layer_meta)
    bytes_acc = 4 * (n_pad * in_0 + n_pad * out_pad_last
                     + sum(k_pad * out_pad for (_, _, _, k_pad, out_pad) in layer_meta))

    out = pl.pallas_call(
        kernel,
        out_shape=jax.ShapeDtypeStruct((n_pad, out_pad_last), jnp.float32),
        grid=(n_tiles,),
        in_specs=in_specs,
        out_specs=pl.BlockSpec((tile_n, out_pad_last), lambda i: (i, 0)),
        scratch_shapes=scratch_shapes,
        compiler_params=pltpu.CompilerParams(
            dimension_semantics=("parallel",),
        ),
        cost_estimate=pl.CostEstimate(
            flops=flops, transcendentals=transcend, bytes_accessed=bytes_acc),
    )(x2d, *packed_weights)
    return out[:N, :out_last]


class KANPallas:
    """Mirror of the PyTorch KAN module (forward only), deterministic init.

    Weights are packed/padded ONCE here (hoisted out of the hot path):
      rows [0:in)          = base_weight.T
      rows [in + j*in + i] = spline_weight[:, i, j]
    matching the kernel's packed-block column order [SiLU | B_0 | ... | B_{coef-1}].
    """

    def __init__(self, layers_hidden, grid_size=5, spline_order=3,
                 grid_range=(-1.0, 1.0), key=None):
        self.grid_size = grid_size
        self.spline_order = spline_order
        h = (grid_range[1] - grid_range[0]) / grid_size
        # Same knot values as the PyTorch `grid` buffer (all rows identical).
        self.grid_vals = tuple(
            float(i * h + grid_range[0])
            for i in range(-spline_order, grid_size + spline_order + 1)
        )
        coef = grid_size + spline_order
        if key is None:
            key = jax.random.PRNGKey(0)

        self.params = []          # raw weights (for the pure-JAX reference)
        self.packed_weights = []  # pre-packed, pre-padded kernel weights
        self.layer_meta = []      # (in_f, out_f, k_pack, k_pad, out_pad)
        for in_f, out_f in zip(layers_hidden, layers_hidden[1:]):
            key, k1, k2 = jax.random.split(key, 3)
            # kaiming_uniform_(a=sqrt(5)) -> U(-1/sqrt(fan_in), 1/sqrt(fan_in))
            bound = 1.0 / math.sqrt(in_f)
            base_w = jax.random.uniform(k1, (out_f, in_f), jnp.float32, -bound, bound)
            spline_w = jax.random.uniform(k2, (out_f, in_f, coef), jnp.float32,
                                          -0.1, 0.1)
            self.params.append((base_w, spline_w))

            k_pack = (coef + 1) * in_f
            k_pad = _round_up(k_pack, 128)
            out_pad = _round_up(out_f, 128)
            w_base = jnp.transpose(base_w)                                   # (in, out)
            w_spl = jnp.transpose(spline_w, (2, 1, 0)).reshape(coef * in_f, out_f)
            w = jnp.concatenate([w_base, w_spl], axis=0)                     # (k_pack, out)
            w = jnp.pad(w, ((0, k_pad - k_pack), (0, out_pad - out_f)))
            self.packed_weights.append(jax.block_until_ready(w))
            self.layer_meta.append((in_f, out_f, k_pack, k_pad, out_pad))

    def __call__(self, x, tile_n=512):
        lead = x.shape[:-1]
        x2d = x.reshape(-1, self.layer_meta[0][0])
        out = kan_forward_pallas(x2d, self.packed_weights, self.layer_meta,
                                 self.grid_vals, self.spline_order, tile_n=tile_n)
        return out.reshape(*lead, out.shape[-1])


# ---------------- pure-JAX reference (for correctness check) ----------------
def _kan_linear_ref(x2d, base_w, spline_w, grid_vals, spline_order):
    grid = jnp.asarray(grid_vals, jnp.float32)
    xe = x2d[:, :, None]
    bases = ((xe >= grid[:-1]) & (xe < grid[1:])).astype(jnp.float32)
    for k in range(1, spline_order + 1):
        bases = (
            (xe - grid[: -(k + 1)]) / (grid[k:-1] - grid[: -(k + 1)]) * bases[:, :, :-1]
            + (grid[k + 1:] - xe) / (grid[k + 1:] - grid[1:-k]) * bases[:, :, 1:]
        )
    silu = x2d * jax.nn.sigmoid(x2d)
    base_out = silu @ base_w.T
    spline_out = bases.reshape(x2d.shape[0], -1) @ spline_w.reshape(
        spline_w.shape[0], -1
    ).T
    return base_out + spline_out


def _kan_ref(model, x):
    lead = x.shape[:-1]
    for base_w, spline_w in model.params:
        x2d = x.reshape(-1, base_w.shape[1])
        x = _kan_linear_ref(x2d, base_w, spline_w, model.grid_vals,
                            model.spline_order)
    return x.reshape(*lead, x.shape[-1])


if __name__ == "__main__":
    key = jax.random.PRNGKey(0)
    key, xkey, mkey = jax.random.split(key, 3)

    layers_hidden = [32, 64, 16]
    x = jax.random.normal(xkey, (2, 4, layers_hidden[0]), jnp.float32)

    model = KANPallas(layers_hidden, grid_size=5, spline_order=3, key=mkey)

    out = model(x)
    out = jax.block_until_ready(out)

    ref = _kan_ref(model, x)
    assert out.shape == (2, 4, layers_hidden[-1]), out.shape
    err = float(jnp.max(jnp.abs(out - ref)))
    assert jnp.allclose(out, ref, atol=1e-4, rtol=1e-4), err
    print("KERNEL_OK")
</pallas_src>

<mosaic_0001>
module attributes {stable_mosaic.version = 11 : i64} {
  func.func @_kan_fused_kernel(%arg0: i32, %arg1: memref<8x32xf32, #tpu.memory_space<vmem>>, %arg2: memref<384x128xf32, #tpu.memory_space<vmem>>, %arg3: memref<640x128xf32, #tpu.memory_space<vmem>>, %arg4: memref<8x128xf32, #tpu.memory_space<vmem>>, %arg5: memref<8x384xf32, #tpu.memory_space<vmem>>, %arg6: memref<8x128xf32, #tpu.memory_space<vmem>>, %arg7: memref<8x640xf32, #tpu.memory_space<vmem>>) attributes {dimension_semantics = [#tpu.dimension_semantics<parallel>], iteration_bounds = array<i64: 1>, scalar_prefetch = 0 : i64, scratch_operands = 3 : i64, tpu.core_type = #tpu.core_type<tc>, window_params = [{transform_indices = @transform_0, window_bounds = array<i64: 8, 32>}, {pipeline_mode = #tpu.pipeline_mode<synchronous>, transform_indices = @transform_1, window_bounds = array<i64: 384, 128>}, {pipeline_mode = #tpu.pipeline_mode<synchronous>, transform_indices = @transform_2, window_bounds = array<i64: 640, 128>}, {transform_indices = @transform_3, window_bounds = array<i64: 8, 128>}]} {
    %cst = arith.constant 0.000000e+00 : f32
    %0 = vector.broadcast %cst : f32 to vector<8x96xf32>
    %c0 = arith.constant 0 : index
    %c288 = arith.constant 288 : index
    %1 = vector.load %arg5[%c0, %c288] : memref<8x384xf32, #tpu.memory_space<vmem>>, vector<8x96xf32>
    tpu.vector_store %arg5[%c0, %c288], %0 {strides = array<i32>} : memref<8x384xf32, #tpu.memory_space<vmem>>, vector<8x96xf32>,
    %c0_i32 = arith.constant 0 : i32
    %c1_i32 = arith.constant 1 : i32
    %2 = arith.muli %c0_i32, %c1_i32 : i32
    %c0_i32_0 = arith.constant 0 : i32
    %3 = arith.addi %c0_i32_0, %2 : i32
    %c8_i32 = arith.constant 8 : i32
    %4 = arith.muli %3, %c8_i32 : i32
    %5 = tpu.assume_multiple %4, 8 : i32
    %6 = arith.index_cast %5 : i32 to index
    %c0_1 = arith.constant 0 : index
    %7 = vector.load %arg1[%6, %c0_1] : memref<8x32xf32, #tpu.memory_space<vmem>>, vector<8x32xf32>
    %cst_2 = arith.constant 0.000000e+00 : f32
    %8 = vector.broadcast %cst_2 : f32 to vector<8x32xf32>
    %9 = arith.subf %8, %7 : vector<8x32xf32>
    %10 = math.exp %9 : vector<8x32xf32>
    %cst_3 = arith.constant 1.000000e+00 : f32
    %11 = vector.broadcast %cst_3 : f32 to vector<8x32xf32>
    %12 = arith.addf %11, %10 : vector<8x32xf32>
    %cst_4 = arith.constant 1.000000e+00 : f32
    %13 = vector.broadcast %cst_4 : f32 to vector<8x32xf32>
    %14 = arith.divf %13, %12 : vector<8x32xf32>
    %15 = arith.mulf %7, %14 : vector<8x32xf32>
    %16 = arith.index_cast %5 : i32 to index
    %c0_5 = arith.constant 0 : index
    %17 = vector.load %arg5[%16, %c0_5] : memref<8x384xf32, #tpu.memory_space<vmem>>, vector<8x32xf32>
    tpu.vector_store %arg5[%16, %c0_5], %15 {strides = array<i32>} : memref<8x384xf32, #tpu.memory_space<vmem>>, vector<8x32xf32>,
    %cst_6 = arith.constant -2.200000e+00 : f32
    %18 = vector.broadcast %cst_6 : f32 to vector<8x32xf32>
    %19 = arith.cmpf oge, %7, %18 : vector<8x32xf32>
    %cst_7 = arith.constant 1.000000e+00 : f32
    %cst_8 = arith.constant 0.000000e+00 : f32
    %20 = vector.broadcast %cst_7 : f32 to vector<8x32xf32>
    %21 = vector.broadcast %cst_8 : f32 to vector<8x32xf32>
    %22 = arith.select %19, %20, %21 : vector<8x32xi1>, vector<8x32xf32>
    %cst_9 = arith.constant -1.800000e+00 : f32
    %23 = vector.broadcast %cst_9 : f32 to vector<8x32xf32>
    %24 = arith.cmpf oge, %7, %23 : vector<8x32xf32>
    %cst_10 = arith.constant 1.000000e+00 : f32
    %cst_11 = arith.constant 0.000000e+00 : f32
    %25 = vector.broadcast %cst_10 : f32 to vector<8x32xf32>
    %26 = vector.broadcast %cst_11 : f32 to vector<8x32xf32>
    %27 = arith.select %24, %25, %26 : vector<8x32xi1>, vector<8x32xf32>
    %cst_12 = arith.constant -1.400000e+00 : f32
    %28 = vector.broadcast %cst_12 : f32 to vector<8x32xf32>
    %29 = arith.cmpf oge, %7, %28 : vector<8x32xf32>
    %cst_13 = arith.constant 1.000000e+00 : f32
    %cst_14 = arith.constant 0.000000e+00 : f32
    %30 = vector.broadcast %cst_13 : f32 to vector<8x32xf32>
    %31 = vector.broadcast %cst_14 : f32 to vector<8x32xf32>
    %32 = arith.select %29, %30, %31 : vector<8x32xi1>, vector<8x32xf32>
    %cst_15 = arith.constant -1.000000e+00 : f32
    %33 = vector.broadcast %cst_15 : f32 to vector<8x32xf32>
    %34 = arith.cmpf oge, %7, %33 : vector<8x32xf32>
    %cst_16 = arith.constant 1.000000e+00 : f32
    %cst_17 = arith.constant 0.000000e+00 : f32
    %35 = vector.broadcast %cst_16 : f32 to vector<8x32xf32>
    %36 = vector.broadcast %cst_17 : f32 to vector<8x32xf32>
    %37 = arith.select %34, %35, %36 : vector<8x32xi1>, vector<8x32xf32>
    %cst_18 = arith.constant -6.000000e-01 : f32
    %38 = vector.broadcast %cst_18 : f32 to vector<8x32xf32>
    %39 = arith.cmpf oge, %7, %38 : vector<8x32xf32>
    %cst_19 = arith.constant 1.000000e+00 : f32
    %cst_20 = arith.constant 0.000000e+00 : f32
    %40 = vector.broadcast %cst_19 : f32 to vector<8x32xf32>
    %41 = vector.broadcast %cst_20 : f32 to vector<8x32xf32>
    %42 = arith.select %39, %40, %41 : vector<8x32xi1>, vector<8x32xf32>
    %cst_21 = arith.constant -2.000000e-01 : f32
    %43 = vector.broadcast %cst_21 : f32 to vector<8x32xf32>
    %44 = arith.cmpf oge, %7, %43 : vector<8x32xf32>
    %cst_22 = arith.constant 1.000000e+00 : f32
    %cst_23 = arith.constant 0.000000e+00 : f32
    %45 = vector.broadcast %cst_22 : f32 to vector<8x32xf32>
    %46 = vector.broadcast %cst_23 : f32 to vector<8x32xf32>
    %47 = arith.select %44, %45, %46 : vector<8x32xi1>, vector<8x32xf32>
    %cst_24 = arith.constant 2.000000e-01 : f32
    %48 = vector.broadcast %cst_24 : f32 to vector<8x32xf32>
    %49 = arith.cmpf oge, %7, %48 : vector<8x32xf32>
    %cst_25 = arith.constant 1.000000e+00 : f32
    %cst_26 = arith.constant 0.000000e+00 : f32
    %50 = vector.broadcast %cst_25 : f32 to vector<8x32xf32>
    %51 = vector.broadcast %cst_26 : f32 to vector<8x32xf32>
    %52 = arith.select %49, %50, %51 : vector<8x32xi1>, vector<8x32xf32>
    %cst_27 = arith.constant 6.000000e-01 : f32
    %53 = vector.broadcast %cst_27 : f32 to vector<8x32xf32>
    %54 = arith.cmpf oge, %7, %53 : vector<8x32xf32>
    %cst_28 = arith.constant 1.000000e+00 : f32
    %cst_29 = arith.constant 0.000000e+00 : f32
    %55 = vector.broadcast %cst_28 : f32 to vector<8x32xf32>
    %56 = vector.broadcast %cst_29 : f32 to vector<8x32xf32>
    %57 = arith.select %54, %55, %56 : vector<8x32xi1>, vector<8x32xf32>
    %cst_30 = arith.constant 1.000000e+00 : f32
    %58 = vector.broadcast %cst_30 : f32 to vector<8x32xf32>
    %59 = arith.cmpf oge, %7, %58 : vector<8x32xf32>
    %cst_31 = arith.constant 1.000000e+00 : f32
    %cst_32 = arith.constant 0.000000e+00 : f32
    %60 = vector.broadcast %cst_31 : f32 to vector<8x32xf32>
    %61 = vector.broadcast %cst_32 : f32 to vector<8x32xf32>
    %62 = arith.select %59, %60, %61 : vector<8x32xi1>, vector<8x32xf32>
    %cst_33 = arith.constant 1.400000e+00 : f32
    %63 = vector.broadcast %cst_33 : f32 to vector<8x32xf32>
    %64 = arith.cmpf oge, %7, %63 : vector<8x32xf32>
    %cst_34 = arith.constant 1.000000e+00 : f32
    %cst_35 = arith.constant 0.000000e+00 : f32
    %65 = vector.broadcast %cst_34 : f32 to vector<8x32xf32>
    %66 = vector.broadcast %cst_35 : f32 to vector<8x32xf32>
    %67 = arith.select %64, %65, %66 : vector<8x32xi1>, vector<8x32xf32>
    %cst_36 = arith.constant 1.800000e+00 : f32
    %68 = vector.broadcast %cst_36 : f32 to vector<8x32xf32>
    %69 = arith.cmpf oge, %7, %68 : vector<8x32xf32>
    %cst_37 = arith.constant 1.000000e+00 : f32
    %cst_38 = arith.constant 0.000000e+00 : f32
    %70 = vector.broadcast %cst_37 : f32 to vector<8x32xf32>
    %71 = vector.broadcast %cst_38 : f32 to vector<8x32xf32>
    %72 = arith.select %69, %70, %71 : vector<8x32xi1>, vector<8x32xf32>
    %cst_39 = arith.constant 2.200000e+00 : f32
    %73 = vector.broadcast %cst_39 : f32 to vector<8x32xf32>
    %74 = arith.cmpf oge, %7, %73 : vector<8x32xf32>
    %cst_40 = arith.constant 1.000000e+00 : f32
    %cst_41 = arith.constant 0.000000e+00 : f32
    %75 = vector.broadcast %cst_40 : f32 to vector<8x32xf32>
    %76 = vector.broadcast %cst_41 : f32 to vector<8x32xf32>
    %77 = arith.select %74, %75, %76 : vector<8x32xi1>, vector<8x32xf32>
    %78 = arith.subf %22, %27 : vector<8x32xf32>
    %79 = arith.subf %27, %32 : vector<8x32xf32>
    %80 = arith.subf %32, %37 : vector<8x32xf32>
    %81 = arith.subf %37, %42 : vector<8x32xf32>
    %82 = arith.subf %42, %47 : vector<8x32xf32>
    %83 = arith.subf %47, %52 : vector<8x32xf32>
    %84 = arith.subf %52, %57 : vector<8x32xf32>
    %85 = arith.subf %57, %62 : vector<8x32xf32>
    %86 = arith.subf %62, %67 : vector<8x32xf32>
    %87 = arith.subf %67, %72 : vector<8x32xf32>
    %88 = arith.subf %72, %77 : vector<8x32xf32>
    %cst_42 = arith.constant -2.200000e+00 : f32
    %89 = vector.broadcast %cst_42 : f32 to vector<8x32xf32>
    %90 = arith.subf %7, %89 : vector<8x32xf32>
    %cst_43 = arith.constant -1.800000e+00 : f32
    %91 = vector.broadcast %cst_43 : f32 to vector<8x32xf32>
    %92 = arith.subf %7, %91 : vector<8x32xf32>
    %cst_44 = arith.constant -1.400000e+00 : f32
    %93 = vector.broadcast %cst_44 : f32 to vector<8x32xf32>
    %94 = arith.subf %7, %93 : vector<8x32xf32>
    %cst_45 = arith.constant -1.000000e+00 : f32
    %95 = vector.broadcast %cst_45 : f32 to vector<8x32xf32>
    %96 = arith.subf %7, %95 : vector<8x32xf32>
    %cst_46 = arith.constant -6.000000e-01 : f32
    %97 = vector.broadcast %cst_46 : f32 to vector<8x32xf32>
    %98 = arith.subf %7, %97 : vector<8x32xf32>
    %cst_47 = arith.constant -2.000000e-01 : f32
    %99 = vector.broadcast %cst_47 : f32 to vector<8x32xf32>
    %100 = arith.subf %7, %99 : vector<8x32xf32>
    %cst_48 = arith.constant 2.000000e-01 : f32
    %101 = vector.broadcast %cst_48 : f32 to vector<8x32xf32>
    %102 = arith.subf %7, %101 : vector<8x32xf32>
    %cst_49 = arith.constant 6.000000e-01 : f32
    %103 = vector.broadcast %cst_49 : f32 to vector<8x32xf32>
    %104 = arith.subf %7, %103 : vector<8x32xf32>
    %cst_50 = arith.constant 1.000000e+00 : f32
    %105 = vector.broadcast %cst_50 : f32 to vector<8x32xf32>
    %106 = arith.subf %7, %105 : vector<8x32xf32>
    %cst_51 = arith.constant 1.400000e+00 : f32
    %107 = vector.broadcast %cst_51 : f32 to vector<8x32xf32>
    %108 = arith.subf %7, %107 : vector<8x32xf32>
    %cst_52 = arith.constant 1.800000e+00 : f32
    %109 = vector.broadcast %cst_52 : f32 to vector<8x32xf32>
    %110 = arith.subf %7, %109 : vector<8x32xf32>
    %cst_53 = arith.constant 2.500000e+00 : f32
    %111 = vector.broadcast %cst_53 : f32 to vector<8x32xf32>
    %112 = arith.mulf %90, %111 : vector<8x32xf32>
    %113 = arith.mulf %112, %78 : vector<8x32xf32>
    %cst_54 = arith.constant 2.500000e+00 : f32
    %114 = vector.broadcast %cst_54 : f32 to vector<8x32xf32>
    %115 = arith.mulf %92, %114 : vector<8x32xf32>
    %116 = arith.mulf %115, %79 : vector<8x32xf32>
    %cst_55 = arith.constant 2.500000e+00 : f32
    %117 = vector.broadcast %cst_55 : f32 to vector<8x32xf32>
    %118 = arith.mulf %94, %117 : vector<8x32xf32>
    %119 = arith.mulf %118, %80 : vector<8x32xf32>
    %cst_56 = arith.constant 2.500000e+00 : f32
    %120 = vector.broadcast %cst_56 : f32 to vector<8x32xf32>
    %121 = arith.mulf %96, %120 : vector<8x32xf32>
    %122 = arith.mulf %121, %81 : vector<8x32xf32>
    %cst_57 = arith.constant 2.500000e+00 : f32
    %123 = vector.broadcast %cst_57 : f32 to vector<8x32xf32>
    %124 = arith.mulf %98, %123 : vector<8x32xf32>
    %125 = arith.mulf %124, %82 : vector<8x32xf32>
    %cst_58 = arith.constant 2.500000e+00 : f32
    %126 = vector.broadcast %cst_58 : f32 to vector<8x32xf32>
    %127 = arith.mulf %100, %126 : vector<8x32xf32>
    %128 = arith.mulf %127, %83 : vector<8x32xf32>
    %cst_59 = arith.constant 2.500000e+00 : f32
    %129 = vector.broadcast %cst_59 : f32 to vector<8x32xf32>
    %130 = arith.mulf %102, %129 : vector<8x32xf32>
    %131 = arith.mulf %130, %84 : vector<8x32xf32>
    %cst_60 = arith.constant 2.500000e+00 : f32
    %132 = vector.broadcast %cst_60 : f32 to vector<8x32xf32>
    %133 = arith.mulf %104, %132 : vector<8x32xf32>
    %134 = arith.mulf %133, %85 : vector<8x32xf32>
    %cst_61 = arith.constant 2.500000e+00 : f32
    %135 = vector.broadcast %cst_61 : f32 to vector<8x32xf32>
    %136 = arith.mulf %106, %135 : vector<8x32xf32>
    %137 = arith.mulf %136, %86 : vector<8x32xf32>
    %cst_62 = arith.constant 2.500000e+00 : f32
    %138 = vector.broadcast %cst_62 : f32 to vector<8x32xf32>
    %139 = arith.mulf %108, %138 : vector<8x32xf32>
    %140 = arith.mulf %139, %87 : vector<8x32xf32>
    %cst_63 = arith.constant 2.500000e+00 : f32
    %141 = vector.broadcast %cst_63 : f32 to vector<8x32xf32>
    %142 = arith.mulf %110, %141 : vector<8x32xf32>
    %143 = arith.mulf %142, %88 : vector<8x32xf32>
    %144 = arith.subf %79, %116 : vector<8x32xf32>
    %145 = arith.addf %113, %144 : vector<8x32xf32>
    %146 = arith.subf %80, %119 : vector<8x32xf32>
    %147 = arith.addf %116, %146 : vector<8x32xf32>
    %148 = arith.subf %81, %122 : vector<8x32xf32>
    %149 = arith.addf %119, %148 : vector<8x32xf32>
    %150 = arith.subf %82, %125 : vector<8x32xf32>
    %151 = arith.addf %122, %150 : vector<8x32xf32>
    %152 = arith.subf %83, %128 : vector<8x32xf32>
    %153 = arith.addf %125, %152 : vector<8x32xf32>
    %154 = arith.subf %84, %131 : vector<8x32xf32>
    %155 = arith.addf %128, %154 : vector<8x32xf32>
    %156 = arith.subf %85, %134 : vector<8x32xf32>
    %157 = arith.addf %131, %156 : vector<8x32xf32>
    %158 = arith.subf %86, %137 : vector<8x32xf32>
    %159 = arith.addf %134, %158 : vector<8x32xf32>
    %160 = arith.subf %87, %140 : vector<8x32xf32>
    %161 = arith.addf %137, %160 : vector<8x32xf32>
    %162 = arith.subf %88, %143 : vector<8x32xf32>
    %163 = arith.addf %140, %162 : vector<8x32xf32>
    %cst_64 = arith.constant 1.250000e+00 : f32
    %164 = vector.broadcast %cst_64 : f32 to vector<8x32xf32>
    %165 = arith.mulf %90, %164 : vector<8x32xf32>
    %166 = arith.mulf %165, %145 : vector<8x32xf32>
    %cst_65 = arith.constant 1.250000e+00 : f32
    %167 = vector.broadcast %cst_65 : f32 to vector<8x32xf32>
    %168 = arith.mulf %92, %167 : vector<8x32xf32>
    %169 = arith.mulf %168, %147 : vector<8x32xf32>
    %cst_66 = arith.constant 1.250000e+00 : f32
    %170 = vector.broadcast %cst_66 : f32 to vector<8x32xf32>
    %171 = arith.mulf %94, %170 : vector<8x32xf32>
    %172 = arith.mulf %171, %149 : vector<8x32xf32>
    %cst_67 = arith.constant 1.250000e+00 : f32
    %173 = vector.broadcast %cst_67 : f32 to vector<8x32xf32>
    %174 = arith.mulf %96, %173 : vector<8x32xf32>
    %175 = arith.mulf %174, %151 : vector<8x32xf32>
    %cst_68 = arith.constant 1.250000e+00 : f32
    %176 = vector.broadcast %cst_68 : f32 to vector<8x32xf32>
    %177 = arith.mulf %98, %176 : vector<8x32xf32>
    %178 = arith.mulf %177, %153 : vector<8x32xf32>
    %cst_69 = arith.constant 1.250000e+00 : f32
    %179 = vector.broadcast %cst_69 : f32 to vector<8x32xf32>
    %180 = arith.mulf %100, %179 : vector<8x32xf32>
    %181 = arith.mulf %180, %155 : vector<8x32xf32>
    %cst_70 = arith.constant 1.250000e+00 : f32
    %182 = vector.broadcast %cst_70 : f32 to vector<8x32xf32>
    %183 = arith.mulf %102, %182 : vector<8x32xf32>
    %184 = arith.mulf %183, %157 : vector<8x32xf32>
    %cst_71 = arith.constant 1.250000e+00 : f32
    %185 = vector.broadcast %cst_71 : f32 to vector<8x32xf32>
    %186 = arith.mulf %104, %185 : vector<8x32xf32>
    %187 = arith.mulf %186, %159 : vector<8x32xf32>
    %cst_72 = arith.constant 1.250000e+00 : f32
    %188 = vector.broadcast %cst_72 : f32 to vector<8x32xf32>
    %189 = arith.mulf %106, %188 : vector<8x32xf32>
    %190 = arith.mulf %189, %161 : vector<8x32xf32>
    %cst_73 = arith.constant 1.250000e+00 : f32
    %191 = vector.broadcast %cst_73 : f32 to vector<8x32xf32>
    %192 = arith.mulf %108, %191 : vector<8x32xf32>
    %193 = arith.mulf %192, %163 : vector<8x32xf32>
    %194 = arith.subf %147, %169 : vector<8x32xf32>
    %195 = arith.addf %166, %194 : vector<8x32xf32>
    %196 = arith.subf %149, %172 : vector<8x32xf32>
    %197 = arith.addf %169, %196 : vector<8x32xf32>
    %198 = arith.subf %151, %175 : vector<8x32xf32>
    %199 = arith.addf %172, %198 : vector<8x32xf32>
    %200 = arith.subf %153, %178 : vector<8x32xf32>
    %201 = arith.addf %175, %200 : vector<8x32xf32>
    %202 = arith.subf %155, %181 : vector<8x32xf32>
    %203 = arith.addf %178, %202 : vector<8x32xf32>
    %204 = arith.subf %157, %184 : vector<8x32xf32>
    %205 = arith.addf %181, %204 : vector<8x32xf32>
    %206 = arith.subf %159, %187 : vector<8x32xf32>
    %207 = arith.addf %184, %206 : vector<8x32xf32>
    %208 = arith.subf %161, %190 : vector<8x32xf32>
    %209 = arith.addf %187, %208 : vector<8x32xf32>
    %210 = arith.subf %163, %193 : vector<8x32xf32>
    %211 = arith.addf %190, %210 : vector<8x32xf32>
    %cst_74 = arith.constant 0.833333313 : f32
    %212 = vector.broadcast %cst_74 : f32 to vector<8x32xf32>
    %213 = arith.mulf %90, %212 : vector<8x32xf32>
    %214 = arith.mulf %213, %195 : vector<8x32xf32>
    %cst_75 = arith.constant 0.833333313 : f32
    %215 = vector.broadcast %cst_75 : f32 to vector<8x32xf32>
    %216 = arith.mulf %92, %215 : vector<8x32xf32>
    %217 = arith.mulf %216, %197 : vector<8x32xf32>
    %cst_76 = arith.constant 0.833333313 : f32
    %218 = vector.broadcast %cst_76 : f32 to vector<8x32xf32>
    %219 = arith.mulf %94, %218 : vector<8x32xf32>
    %220 = arith.mulf %219, %199 : vector<8x32xf32>
    %cst_77 = arith.constant 0.833333313 : f32
    %221 = vector.broadcast %cst_77 : f32 to vector<8x32xf32>
    %222 = arith.mulf %96, %221 : vector<8x32xf32>
    %223 = arith.mulf %222, %201 : vector<8x32xf32>
    %cst_78 = arith.constant 0.833333313 : f32
    %224 = vector.broadcast %cst_78 : f32 to vector<8x32xf32>
    %225 = arith.mulf %98, %224 : vector<8x32xf32>
    %226 = arith.mulf %225, %203 : vector<8x32xf32>
    %cst_79 = arith.constant 0.833333313 : f32
    %227 = vector.broadcast %cst_79 : f32 to vector<8x32xf32>
    %228 = arith.mulf %100, %227 : vector<8x32xf32>
    %229 = arith.mulf %228, %205 : vector<8x32xf32>
    %cst_80 = arith.constant 0.833333313 : f32
    %230 = vector.broadcast %cst_80 : f32 to vector<8x32xf32>
    %231 = arith.mulf %102, %230 : vector<8x32xf32>
    %232 = arith.mulf %231, %207 : vector<8x32xf32>
    %cst_81 = arith.constant 0.833333313 : f32
    %233 = vector.broadcast %cst_81 : f32 to vector<8x32xf32>
    %234 = arith.mulf %104, %233 : vector<8x32xf32>
    %235 = arith.mulf %234, %209 : vector<8x32xf32>
    %cst_82 = arith.constant 0.833333313 : f32
    %236 = vector.broadcast %cst_82 : f32 to vector<8x32xf32>
    %237 = arith.mulf %106, %236 : vector<8x32xf32>
    %238 = arith.mulf %237, %211 : vector<8x32xf32>
    %239 = arith.subf %197, %217 : vector<8x32xf32>
    %240 = arith.addf %214, %239 : vector<8x32xf32>
    %241 = arith.subf %199, %220 : vector<8x32xf32>
    %242 = arith.addf %217, %241 : vector<8x32xf32>
    %243 = arith.subf %201, %223 : vector<8x32xf32>
    %244 = arith.addf %220, %243 : vector<8x32xf32>
    %245 = arith.subf %203, %226 : vector<8x32xf32>
    %246 = arith.addf %223, %245 : vector<8x32xf32>
    %247 = arith.subf %205, %229 : vector<8x32xf32>
    %248 = arith.addf %226, %247 : vector<8x32xf32>
    %249 = arith.subf %207, %232 : vector<8x32xf32>
    %250 = arith.addf %229, %249 : vector<8x32xf32>
    %251 = arith.subf %209, %235 : vector<8x32xf32>
    %252 = arith.addf %232, %251 : vector<8x32xf32>
    %253 = arith.subf %211, %238 : vector<8x32xf32>
    %254 = arith.addf %235, %253 : vector<8x32xf32>
    %255 = arith.index_cast %5 : i32 to index
    %c32 = arith.constant 32 : index
    %256 = vector.load %arg5[%255, %c32] : memref<8x384xf32, #tpu.memory_space<vmem>>, vector<8x32xf32>
    tpu.vector_store %arg5[%255, %c32], %240 {strides = array<i32>} : memref<8x384xf32, #tpu.memory_space<vmem>>, vector<8x32xf32>,
    %257 = arith.index_cast %5 : i32 to index
    %c64 = arith.constant 64 : index
    %258 = vector.load %arg5[%257, %c64] : memref<8x384xf32, #tpu.memory_space<vmem>>, vector<8x32xf32>
    tpu.vector_store %arg5[%257, %c64], %242 {strides = array<i32>} : memref<8x384xf32, #tpu.memory_space<vmem>>, vector<8x32xf32>,
    %259 = arith.index_cast %5 : i32 to index
    %c96 = arith.constant 96 : index
    %260 = vector.load %arg5[%259, %c96] : memref<8x384xf32, #tpu.memory_space<vmem>>, vector<8x32xf32>
    tpu.vector_store %arg5[%259, %c96], %244 {strides = array<i32>} : memref<8x384xf32, #tpu.memory_space<vmem>>, vector<8x32xf32>,
    %261 = arith.index_cast %5 : i32 to index
    %c128 = arith.constant 128 : index
    %262 = vector.load %arg5[%261, %c128] : memref<8x384xf32, #tpu.memory_space<vmem>>, vector<8x32xf32>
    tpu.vector_store %arg5[%261, %c128], %246 {strides = array<i32>} : memref<8x384xf32, #tpu.memory_space<vmem>>, vector<8x32xf32>,
    %263 = arith.index_cast %5 : i32 to index
    %c160 = arith.constant 160 : index
    %264 = vector.load %arg5[%263, %c160] : memref<8x384xf32, #tpu.memory_space<vmem>>, vector<8x32xf32>
    tpu.vector_store %arg5[%263, %c160], %248 {strides = array<i32>} : memref<8x384xf32, #tpu.memory_space<vmem>>, vector<8x32xf32>,
    %265 = arith.index_cast %5 : i32 to index
    %c192 = arith.constant 192 : index
    %266 = vector.load %arg5[%265, %c192] : memref<8x384xf32, #tpu.memory_space<vmem>>, vector<8x32xf32>
    tpu.vector_store %arg5[%265, %c192], %250 {strides = array<i32>} : memref<8x384xf32, #tpu.memory_space<vmem>>, vector<8x32xf32>,
    %267 = arith.index_cast %5 : i32 to index
    %c224 = arith.constant 224 : index
    %268 = vector.load %arg5[%267, %c224] : memref<8x384xf32, #tpu.memory_space<vmem>>, vector<8x32xf32>
    tpu.vector_store %arg5[%267, %c224], %252 {strides = array<i32>} : memref<8x384xf32, #tpu.memory_space<vmem>>, vector<8x32xf32>,
    %269 = arith.index_cast %5 : i32 to index
    %c256 = arith.constant 256 : index
    %270 = vector.load %arg5[%269, %c256] : memref<8x384xf32, #tpu.memory_space<vmem>>, vector<8x32xf32>
    tpu.vector_store %arg5[%269, %c256], %254 {strides = array<i32>} : memref<8x384xf32, #tpu.memory_space<vmem>>, vector<8x32xf32>,
    %c1_i32_83 = arith.constant 1 : i32
    %c0_84 = arith.constant 0 : index
    %c0_85 = arith.constant 0 : index
    %271 = vector.load %arg5[%c0_84, %c0_85] : memref<8x384xf32, #tpu.memory_space<vmem>>, vector<8x384xf32>
    %c0_86 = arith.constant 0 : index
    %c0_87 = arith.constant 0 : index
    %272 = vector.load %arg2[%c0_86, %c0_87] : memref<384x128xf32, #tpu.memory_space<vmem>>, vector<384x128xf32>
    %cst_88 = arith.constant dense<0.000000e+00> : vector<8x128xf32>
    %273 = tpu.matmul %271, %272, %cst_88 {dimension_numbers = #tpu.dot_dimension_numbers<[1], [0], [0], [1], [0, 0, 1, 1], [], []>} : vector<8x384xf32>, vector<384x128xf32>, vector<8x128xf32> -> vector<8x128xf32>
    %c0_89 = arith.constant 0 : index
    %c0_90 = arith.constant 0 : index
    %274 = vector.load %arg6[%c0_89, %c0_90] : memref<8x128xf32, #tpu.memory_space<vmem>>, vector<8x128xf32>
    tpu.vector_store %arg6[%c0_89, %c0_90], %273 {strides = array<i32>} : memref<8x128xf32, #tpu.memory_space<vmem>>, vector<8x128xf32>,
    %cst_91 = arith.constant 0.000000e+00 : f32
    %275 = vector.broadcast %cst_91 : f32 to vector<8x64xf32>
    %c0_92 = arith.constant 0 : index
    %c576 = arith.constant 576 : index
    %276 = vector.load %arg7[%c0_92, %c576] : memref<8x640xf32, #tpu.memory_space<vmem>>, vector<8x64xf32>
    tpu.vector_store %arg7[%c0_92, %c576], %275 {strides = array<i32>} : memref<8x640xf32, #tpu.memory_space<vmem>>, vector<8x64xf32>,
    %c0_i32_93 = arith.constant 0 : i32
    %c1_i32_94 = arith.constant 1 : i32
    %277 = arith.muli %c0_i32_93, %c1_i32_94 : i32
    %c0_i32_95 = arith.constant 0 : i32
    %278 = arith.addi %c0_i32_95, %277 : i32
    %c8_i32_96 = arith.constant 8 : i32
    %279 = arith.muli %278, %c8_i32_96 : i32
    %280 = tpu.assume_multiple %279, 8 : i32
    %281 = arith.index_cast %280 : i32 to index
    %c0_97 = arith.constant 0 : index
    %282 = vector.load %arg6[%281, %c0_97] : memref<8x128xf32, #tpu.memory_space<vmem>>, vector<8x64xf32>
    %cst_98 = arith.constant 0.000000e+00 : f32
    %283 = vector.broadcast %cst_98 : f32 to vector<8x64xf32>
    %284 = arith.subf %283, %282 : vector<8x64xf32>
    %285 = math.exp %284 : vector<8x64xf32>
    %cst_99 = arith.constant 1.000000e+00 : f32
    %286 = vector.broadcast %cst_99 : f32 to vector<8x64xf32>
    %287 = arith.addf %286, %285 : vector<8x64xf32>
    %cst_100 = arith.constant 1.000000e+00 : f32
    %288 = vector.broadcast %cst_100 : f32 to vector<8x64xf32>
    %289 = arith.divf %288, %287 : vector<8x64xf32>
    %290 = arith.mulf %282, %289 : vector<8x64xf32>
    %291 = arith.index_cast %280 : i32 to index
    %c0_101 = arith.constant 0 : index
    %292 = vector.load %arg7[%291, %c0_101] : memref<8x640xf32, #tpu.memory_space<vmem>>, vector<8x64xf32>
    tpu.vector_store %arg7[%291, %c0_101], %290 {strides = array<i32>} : memref<8x640xf32, #tpu.memory_space<vmem>>, vector<8x64xf32>,
    %cst_102 = arith.constant -2.200000e+00 : f32
    %293 = vector.broadcast %cst_102 : f32 to vector<8x64xf32>
    %294 = arith.cmpf oge, %282, %293 : vector<8x64xf32>
    %cst_103 = arith.constant 1.000000e+00 : f32
    %cst_104 = arith.constant 0.000000e+00 : f32
    %295 = vector.broadcast %cst_103 : f32 to vector<8x64xf32>
    %296 = vector.broadcast %cst_104 : f32 to vector<8x64xf32>
    %297 = arith.select %294, %295, %296 : vector<8x64xi1>, vector<8x64xf32>
    %cst_105 = arith.constant -1.800000e+00 : f32
    %298 = vector.broadcast %cst_105 : f32 to vector<8x64xf32>
    %299 = arith.cmpf oge, %282, %298 : vector<8x64xf32>
    %cst_106 = arith.constant 1.000000e+00 : f32
    %cst_107 = arith.constant 0.000000e+00 : f32
    %300 = vector.broadcast %cst_106 : f32 to vector<8x64xf32>
    %301 = vector.broadcast %cst_107 : f32 to vector<8x64xf32>
    %302 = arith.select %299, %300, %301 : vector<8x64xi1>, vector<8x64xf32>
    %cst_108 = arith.constant -1.400000e+00 : f32
    %303 = vector.broadcast %cst_108 : f32 to vector<8x64xf32>
    %304 = arith.cmpf oge, %282, %303 : vector<8x64xf32>
    %cst_109 = arith.constant 1.000000e+00 : f32
    %cst_110 = arith.constant 0.000000e+00 : f32
    %305 = vector.broadcast %cst_109 : f32 to vector<8x64xf32>
    %306 = vector.broadcast %cst_110 : f32 to vector<8x64xf32>
    %307 = arith.select %304, %305, %306 : vector<8x64xi1>, vector<8x64xf32>
    %cst_111 = arith.constant -1.000000e+00 : f32
    %308 = vector.broadcast %cst_111 : f32 to vector<8x64xf32>
    %309 = arith.cmpf oge, %282, %308 : vector<8x64xf32>
    %cst_112 = arith.constant 1.000000e+00 : f32
    %cst_113 = arith.constant 0.000000e+00 : f32
    %310 = vector.broadcast %cst_112 : f32 to vector<8x64xf32>
    %311 = vector.broadcast %cst_113 : f32 to vector<8x64xf32>
    %312 = arith.select %309, %310, %311 : vector<8x64xi1>, vector<8x64xf32>
    %cst_114 = arith.constant -6.000000e-01 : f32
    %313 = vector.broadcast %cst_114 : f32 to vector<8x64xf32>
    %314 = arith.cmpf oge, %282, %313 : vector<8x64xf32>
    %cst_115 = arith.constant 1.000000e+00 : f32
    %cst_116 = arith.constant 0.000000e+00 : f32
    %315 = vector.broadcast %cst_115 : f32 to vector<8x64xf32>
    %316 = vector.broadcast %cst_116 : f32 to vector<8x64xf32>
    %317 = arith.select %314, %315, %316 : vector<8x64xi1>, vector<8x64xf32>
    %cst_117 = arith.constant -2.000000e-01 : f32
    %318 = vector.broadcast %cst_117 : f32 to vector<8x64xf32>
    %319 = arith.cmpf oge, %282, %318 : vector<8x64xf32>
    %cst_118 = arith.constant 1.000000e+00 : f32
    %cst_119 = arith.constant 0.000000e+00 : f32
    %320 = vector.broadcast %cst_118 : f32 to vector<8x64xf32>
    %321 = vector.broadcast %cst_119 : f32 to vector<8x64xf32>
    %322 = arith.select %319, %320, %321 : vector<8x64xi1>, vector<8x64xf32>
    %cst_120 = arith.constant 2.000000e-01 : f32
    %323 = vector.broadcast %cst_120 : f32 to vector<8x64xf32>
    %324 = arith.cmpf oge, %282, %323 : vector<8x64xf32>
    %cst_121 = arith.constant 1.000000e+00 : f32
    %cst_122 = arith.constant 0.000000e+00 : f32
    %325 = vector.broadcast %cst_121 : f32 to vector<8x64xf32>
    %326 = vector.broadcast %cst_122 : f32 to vector<8x64xf32>
    %327 = arith.select %324, %325, %326 : vector<8x64xi1>, vector<8x64xf32>
    %cst_123 = arith.constant 6.000000e-01 : f32
    %328 = vector.broadcast %cst_123 : f32 to vector<8x64xf32>
    %329 = arith.cmpf oge, %282, %328 : vector<8x64xf32>
    %cst_124 = arith.constant 1.000000e+00 : f32
    %cst_125 = arith.constant 0.000000e+00 : f32
    %330 = vector.broadcast %cst_124 : f32 to vector<8x64xf32>
    %331 = vector.broadcast %cst_125 : f32 to vector<8x64xf32>
    %332 = arith.select %329, %330, %331 : vector<8x64xi1>, vector<8x64xf32>
    %cst_126 = arith.constant 1.000000e+00 : f32
    %333 = vector.broadcast %cst_126 : f32 to vector<8x64xf32>
    %334 = arith.cmpf oge, %282, %333 : vector<8x64xf32>
    %cst_127 = arith.constant 1.000000e+00 : f32
    %cst_128 = arith.constant 0.000000e+00 : f32
    %335 = vector.broadcast %cst_127 : f32 to vector<8x64xf32>
    %336 = vector.broadcast %cst_128 : f32 to vector<8x64xf32>
    %337 = arith.select %334, %335, %336 : vector<8x64xi1>, vector<8x64xf32>
    %cst_129 = arith.constant 1.400000e+00 : f32
    %338 = vector.broadcast %cst_129 : f32 to vector<8x64xf32>
    %339 = arith.cmpf oge, %282, %338 : vector<8x64xf32>
    %cst_130 = arith.constant 1.000000e+00 : f32
    %cst_131 = arith.constant 0.000000e+00 : f32
    %340 = vector.broadcast %cst_130 : f32 to vector<8x64xf32>
    %341 = vector.broadcast %cst_131 : f32 to vector<8x64xf32>
    %342 = arith.select %339, %340, %341 : vector<8x64xi1>, vector<8x64xf32>
    %cst_132 = arith.constant 1.800000e+00 : f32
    %343 = vector.broadcast %cst_132 : f32 to vector<8x64xf32>
    %344 = arith.cmpf oge, %282, %343 : vector<8x64xf32>
    %cst_133 = arith.constant 1.000000e+00 : f32
    %cst_134 = arith.constant 0.000000e+00 : f32
    %345 = vector.broadcast %cst_133 : f32 to vector<8x64xf32>
    %346 = vector.broadcast %cst_134 : f32 to vector<8x64xf32>
    %347 = arith.select %344, %345, %346 : vector<8x64xi1>, vector<8x64xf32>
    %cst_135 = arith.constant 2.200000e+00 : f32
    %348 = vector.broadcast %cst_135 : f32 to vector<8x64xf32>
    %349 = arith.cmpf oge, %282, %348 : vector<8x64xf32>
    %cst_136 = arith.constant 1.000000e+00 : f32
    %cst_137 = arith.constant 0.000000e+00 : f32
    %350 = vector.broadcast %cst_136 : f32 to vector<8x64xf32>
    %351 = vector.broadcast %cst_137 : f32 to vector<8x64xf32>
    %352 = arith.select %349, %350, %351 : vector<8x64xi1>, vector<8x64xf32>
    %353 = arith.subf %297, %302 : vector<8x64xf32>
    %354 = arith.subf %302, %307 : vector<8x64xf32>
    %355 = arith.subf %307, %312 : vector<8x64xf32>
    %356 = arith.subf %312, %317 : vector<8x64xf32>
    %357 = arith.subf %317, %322 : vector<8x64xf32>
    %358 = arith.subf %322, %327 : vector<8x64xf32>
    %359 = arith.subf %327, %332 : vector<8x64xf32>
    %360 = arith.subf %332, %337 : vector<8x64xf32>
    %361 = arith.subf %337, %342 : vector<8x64xf32>
    %362 = arith.subf %342, %347 : vector<8x64xf32>
    %363 = arith.subf %347, %352 : vector<8x64xf32>
    %cst_138 = arith.constant -2.200000e+00 : f32
    %364 = vector.broadcast %cst_138 : f32 to vector<8x64xf32>
    %365 = arith.subf %282, %364 : vector<8x64xf32>
    %cst_139 = arith.constant -1.800000e+00 : f32
    %366 = vector.broadcast %cst_139 : f32 to vector<8x64xf32>
    %367 = arith.subf %282, %366 : vector<8x64xf32>
    %cst_140 = arith.constant -1.400000e+00 : f32
    %368 = vector.broadcast %cst_140 : f32 to vector<8x64xf32>
    %369 = arith.subf %282, %368 : vector<8x64xf32>
    %cst_141 = arith.constant -1.000000e+00 : f32
    %370 = vector.broadcast %cst_141 : f32 to vector<8x64xf32>
    %371 = arith.subf %282, %370 : vector<8x64xf32>
    %cst_142 = arith.constant -6.000000e-01 : f32
    %372 = vector.broadcast %cst_142 : f32 to vector<8x64xf32>
    %373 = arith.subf %282, %372 : vector<8x64xf32>
    %cst_143 = arith.constant -2.000000e-01 : f32
    %374 = vector.broadcast %cst_143 : f32 to vector<8x64xf32>
    %375 = arith.subf %282, %374 : vector<8x64xf32>
    %cst_144 = arith.constant 2.000000e-01 : f32
    %376 = vector.broadcast %cst_144 : f32 to vector<8x64xf32>
    %377 = arith.subf %282, %376 : vector<8x64xf32>
    %cst_145 = arith.constant 6.000000e-01 : f32
    %378 = vector.broadcast %cst_145 : f32 to vector<8x64xf32>
    %379 = arith.subf %282, %378 : vector<8x64xf32>
    %cst_146 = arith.constant 1.000000e+00 : f32
    %380 = vector.broadcast %cst_146 : f32 to vector<8x64xf32>
    %381 = arith.subf %282, %380 : vector<8x64xf32>
    %cst_147 = arith.constant 1.400000e+00 : f32
    %382 = vector.broadcast %cst_147 : f32 to vector<8x64xf32>
    %383 = arith.subf %282, %382 : vector<8x64xf32>
    %cst_148 = arith.constant 1.800000e+00 : f32
    %384 = vector.broadcast %cst_148 : f32 to vector<8x64xf32>
    %385 = arith.subf %282, %384 : vector<8x64xf32>
    %cst_149 = arith.constant 2.500000e+00 : f32
    %386 = vector.broadcast %cst_149 : f32 to vector<8x64xf32>
    %387 = arith.mulf %365, %386 : vector<8x64xf32>
    %388 = arith.mulf %387, %353 : vector<8x64xf32>
    %cst_150 = arith.constant 2.500000e+00 : f32
    %389 = vector.broadcast %cst_150 : f32 to vector<8x64xf32>
    %390 = arith.mulf %367, %389 : vector<8x64xf32>
    %391 = arith.mulf %390, %354 : vector<8x64xf32>
    %cst_151 = arith.constant 2.500000e+00 : f32
    %392 = vector.broadcast %cst_151 : f32 to vector<8x64xf32>
    %393 = arith.mulf %369, %392 : vector<8x64xf32>
    %394 = arith.mulf %393, %355 : vector<8x64xf32>
    %cst_152 = arith.constant 2.500000e+00 : f32
    %395 = vector.broadcast %cst_152 : f32 to vector<8x64xf32>
    %396 = arith.mulf %371, %395 : vector<8x64xf32>
    %397 = arith.mulf %396, %356 : vector<8x64xf32>
    %cst_153 = arith.constant 2.500000e+00 : f32
    %398 = vector.broadcast %cst_153 : f32 to vector<8x64xf32>
    %399 = arith.mulf %373, %398 : vector<8x64xf32>
    %400 = arith.mulf %399, %357 : vector<8x64xf32>
    %cst_154 = arith.constant 2.500000e+00 : f32
    %401 = vector.broadcast %cst_154 : f32 to vector<8x64xf32>
    %402 = arith.mulf %375, %401 : vector<8x64xf32>
    %403 = arith.mulf %402, %358 : vector<8x64xf32>
    %cst_155 = arith.constant 2.500000e+00 : f32
    %404 = vector.broadcast %cst_155 : f32 to vector<8x64xf32>
    %405 = arith.mulf %377, %404 : vector<8x64xf32>
    %406 = arith.mulf %405, %359 : vector<8x64xf32>
    %cst_156 = arith.constant 2.500000e+00 : f32
    %407 = vector.broadcast %cst_156 : f32 to vector<8x64xf32>
    %408 = arith.mulf %379, %407 : vector<8x64xf32>
    %409 = arith.mulf %408, %360 : vector<8x64xf32>
    %cst_157 = arith.constant 2.500000e+00 : f32
    %410 = vector.broadcast %cst_157 : f32 to vector<8x64xf32>
    %411 = arith.mulf %381, %410 : vector<8x64xf32>
    %412 = arith.mulf %411, %361 : vector<8x64xf32>
    %cst_158 = arith.constant 2.500000e+00 : f32
    %413 = vector.broadcast %cst_158 : f32 to vector<8x64xf32>
    %414 = arith.mulf %383, %413 : vector<8x64xf32>
    %415 = arith.mulf %414, %362 : vector<8x64xf32>
    %cst_159 = arith.constant 2.500000e+00 : f32
    %416 = vector.broadcast %cst_159 : f32 to vector<8x64xf32>
    %417 = arith.mulf %385, %416 : vector<8x64xf32>
    %418 = arith.mulf %417, %363 : vector<8x64xf32>
    %419 = arith.subf %354, %391 : vector<8x64xf32>
    %420 = arith.addf %388, %419 : vector<8x64xf32>
    %421 = arith.subf %355, %394 : vector<8x64xf32>
    %422 = arith.addf %391, %421 : vector<8x64xf32>
    %423 = arith.subf %356, %397 : vector<8x64xf32>
    %424 = arith.addf %394, %423 : vector<8x64xf32>
    %425 = arith.subf %357, %400 : vector<8x64xf32>
    %426 = arith.addf %397, %425 : vector<8x64xf32>
    %427 = arith.subf %358, %403 : vector<8x64xf32>
    %428 = arith.addf %400, %427 : vector<8x64xf32>
    %429 = arith.subf %359, %406 : vector<8x64xf32>
    %430 = arith.addf %403, %429 : vector<8x64xf32>
    %431 = arith.subf %360, %409 : vector<8x64xf32>
    %432 = arith.addf %406, %431 : vector<8x64xf32>
    %433 = arith.subf %361, %412 : vector<8x64xf32>
    %434 = arith.addf %409, %433 : vector<8x64xf32>
    %435 = arith.subf %362, %415 : vector<8x64xf32>
    %436 = arith.addf %412, %435 : vector<8x64xf32>
    %437 = arith.subf %363, %418 : vector<8x64xf32>
    %438 = arith.addf %415, %437 : vector<8x64xf32>
    %cst_160 = arith.constant 1.250000e+00 : f32
    %439 = vector.broadcast %cst_160 : f32 to vector<8x64xf32>
    %440 = arith.mulf %365, %439 : vector<8x64xf32>
    %441 = arith.mulf %440, %420 : vector<8x64xf32>
    %cst_161 = arith.constant 1.250000e+00 : f32
    %442 = vector.broadcast %cst_161 : f32 to vector<8x64xf32>
    %443 = arith.mulf %367, %442 : vector<8x64xf32>
    %444 = arith.mulf %443, %422 : vector<8x64xf32>
    %cst_162 = arith.constant 1.250000e+00 : f32
    %445 = vector.broadcast %cst_162 : f32 to vector<8x64xf32>
    %446 = arith.mulf %369, %445 : vector<8x64xf32>
    %447 = arith.mulf %446, %424 : vector<8x64xf32>
    %cst_163 = arith.constant 1.250000e+00 : f32
    %448 = vector.broadcast %cst_163 : f32 to vector<8x64xf32>
    %449 = arith.mulf %371, %448 : vector<8x64xf32>
    %450 = arith.mulf %449, %426 : vector<8x64xf32>
    %cst_164 = arith.constant 1.250000e+00 : f32
    %451 = vector.broadcast %cst_164 : f32 to vector<8x64xf32>
    %452 = arith.mulf %373, %451 : vector<8x64xf32>
    %453 = arith.mulf %452, %428 : vector<8x64xf32>
    %cst_165 = arith.constant 1.250000e+00 : f32
    %454 = vector.broadcast %cst_165 : f32 to vector<8x64xf32>
    %455 = arith.mulf %375, %454 : vector<8x64xf32>
    %456 = arith.mulf %455, %430 : vector<8x64xf32>
    %cst_166 = arith.constant 1.250000e+00 : f32
    %457 = vector.broadcast %cst_166 : f32 to vector<8x64xf32>
    %458 = arith.mulf %377, %457 : vector<8x64xf32>
    %459 = arith.mulf %458, %432 : vector<8x64xf32>
    %cst_167 = arith.constant 1.250000e+00 : f32
    %460 = vector.broadcast %cst_167 : f32 to vector<8x64xf32>
    %461 = arith.mulf %379, %460 : vector<8x64xf32>
    %462 = arith.mulf %461, %434 : vector<8x64xf32>
    %cst_168 = arith.constant 1.250000e+00 : f32
    %463 = vector.broadcast %cst_168 : f32 to vector<8x64xf32>
    %464 = arith.mulf %381, %463 : vector<8x64xf32>
    %465 = arith.mulf %464, %436 : vector<8x64xf32>
    %cst_169 = arith.constant 1.250000e+00 : f32
    %466 = vector.broadcast %cst_169 : f32 to vector<8x64xf32>
    %467 = arith.mulf %383, %466 : vector<8x64xf32>
    %468 = arith.mulf %467, %438 : vector<8x64xf32>
    %469 = arith.subf %422, %444 : vector<8x64xf32>
    %470 = arith.addf %441, %469 : vector<8x64xf32>
    %471 = arith.subf %424, %447 : vector<8x64xf32>
    %472 = arith.addf %444, %471 : vector<8x64xf32>
    %473 = arith.subf %426, %450 : vector<8x64xf32>
    %474 = arith.addf %447, %473 : vector<8x64xf32>
    %475 = arith.subf %428, %453 : vector<8x64xf32>
    %476 = arith.addf %450, %475 : vector<8x64xf32>
    %477 = arith.subf %430, %456 : vector<8x64xf32>
    %478 = arith.addf %453, %477 : vector<8x64xf32>
    %479 = arith.subf %432, %459 : vector<8x64xf32>
    %480 = arith.addf %456, %479 : vector<8x64xf32>
    %481 = arith.subf %434, %462 : vector<8x64xf32>
    %482 = arith.addf %459, %481 : vector<8x64xf32>
    %483 = arith.subf %436, %465 : vector<8x64xf32>
    %484 = arith.addf %462, %483 : vector<8x64xf32>
    %485 = arith.subf %438, %468 : vector<8x64xf32>
    %486 = arith.addf %465, %485 : vector<8x64xf32>
    %cst_170 = arith.constant 0.833333313 : f32
    %487 = vector.broadcast %cst_170 : f32 to vector<8x64xf32>
    %488 = arith.mulf %365, %487 : vector<8x64xf32>
    %489 = arith.mulf %488, %470 : vector<8x64xf32>
    %cst_171 = arith.constant 0.833333313 : f32
    %490 = vector.broadcast %cst_171 : f32 to vector<8x64xf32>
    %491 = arith.mulf %367, %490 : vector<8x64xf32>
    %492 = arith.mulf %491, %472 : vector<8x64xf32>
    %cst_172 = arith.constant 0.833333313 : f32
    %493 = vector.broadcast %cst_172 : f32 to vector<8x64xf32>
    %494 = arith.mulf %369, %493 : vector<8x64xf32>
    %495 = arith.mulf %494, %474 : vector<8x64xf32>
    %cst_173 = arith.constant 0.833333313 : f32
    %496 = vector.broadcast %cst_173 : f32 to vector<8x64xf32>
    %497 = arith.mulf %371, %496 : vector<8x64xf32>
    %498 = arith.mulf %497, %476 : vector<8x64xf32>
    %cst_174 = arith.constant 0.833333313 : f32
    %499 = vector.broadcast %cst_174 : f32 to vector<8x64xf32>
    %500 = arith.mulf %373, %499 : vector<8x64xf32>
    %501 = arith.mulf %500, %478 : vector<8x64xf32>
    %cst_175 = arith.constant 0.833333313 : f32
    %502 = vector.broadcast %cst_175 : f32 to vector<8x64xf32>
    %503 = arith.mulf %375, %502 : vector<8x64xf32>
    %504 = arith.mulf %503, %480 : vector<8x64xf32>
    %cst_176 = arith.constant 0.833333313 : f32
    %505 = vector.broadcast %cst_176 : f32 to vector<8x64xf32>
    %506 = arith.mulf %377, %505 : vector<8x64xf32>
    %507 = arith.mulf %506, %482 : vector<8x64xf32>
    %cst_177 = arith.constant 0.833333313 : f32
    %508 = vector.broadcast %cst_177 : f32 to vector<8x64xf32>
    %509 = arith.mulf %379, %508 : vector<8x64xf32>
    %510 = arith.mulf %509, %484 : vector<8x64xf32>
    %cst_178 = arith.constant 0.833333313 : f32
    %511 = vector.broadcast %cst_178 : f32 to vector<8x64xf32>
    %512 = arith.mulf %381, %511 : vector<8x64xf32>
    %513 = arith.mulf %512, %486 : vector<8x64xf32>
    %514 = arith.subf %472, %492 : vector<8x64xf32>
    %515 = arith.addf %489, %514 : vector<8x64xf32>
    %516 = arith.subf %474, %495 : vector<8x64xf32>
    %517 = arith.addf %492, %516 : vector<8x64xf32>
    %518 = arith.subf %476, %498 : vector<8x64xf32>
    %519 = arith.addf %495, %518 : vector<8x64xf32>
    %520 = arith.subf %478, %501 : vector<8x64xf32>
    %521 = arith.addf %498, %520 : vector<8x64xf32>
    %522 = arith.subf %480, %504 : vector<8x64xf32>
    %523 = arith.addf %501, %522 : vector<8x64xf32>
    %524 = arith.subf %482, %507 : vector<8x64xf32>
    %525 = arith.addf %504, %524 : vector<8x64xf32>
    %526 = arith.subf %484, %510 : vector<8x64xf32>
    %527 = arith.addf %507, %526 : vector<8x64xf32>
    %528 = arith.subf %486, %513 : vector<8x64xf32>
    %529 = arith.addf %510, %528 : vector<8x64xf32>
    %530 = arith.index_cast %280 : i32 to index
    %c64_179 = arith.constant 64 : index
    %531 = vector.load %arg7[%530, %c64_179] : memref<8x640xf32, #tpu.memory_space<vmem>>, vector<8x64xf32>
    tpu.vector_store %arg7[%530, %c64_179], %515 {strides = array<i32>} : memref<8x640xf32, #tpu.memory_space<vmem>>, vector<8x64xf32>,
    %532 = arith.index_cast %280 : i32 to index
    %c128_180 = arith.constant 128 : index
    %533 = vector.load %arg7[%532, %c128_180] : memref<8x640xf32, #tpu.memory_space<vmem>>, vector<8x64xf32>
    tpu.vector_store %arg7[%532, %c128_180], %517 {strides = array<i32>} : memref<8x640xf32, #tpu.memory_space<vmem>>, vector<8x64xf32>,
    %534 = arith.index_cast %280 : i32 to index
    %c192_181 = arith.constant 192 : index
    %535 = vector.load %arg7[%534, %c192_181] : memref<8x640xf32, #tpu.memory_space<vmem>>, vector<8x64xf32>
    tpu.vector_store %arg7[%534, %c192_181], %519 {strides = array<i32>} : memref<8x640xf32, #tpu.memory_space<vmem>>, vector<8x64xf32>,
    %536 = arith.index_cast %280 : i32 to index
    %c256_182 = arith.constant 256 : index
    %537 = vector.load %arg7[%536, %c256_182] : memref<8x640xf32, #tpu.memory_space<vmem>>, vector<8x64xf32>
    tpu.vector_store %arg7[%536, %c256_182], %521 {strides = array<i32>} : memref<8x640xf32, #tpu.memory_space<vmem>>, vector<8x64xf32>,
    %538 = arith.index_cast %280 : i32 to index
    %c320 = arith.constant 320 : index
    %539 = vector.load %arg7[%538, %c320] : memref<8x640xf32, #tpu.memory_space<vmem>>, vector<8x64xf32>
    tpu.vector_store %arg7[%538, %c320], %523 {strides = array<i32>} : memref<8x640xf32, #tpu.memory_space<vmem>>, vector<8x64xf32>,
    %540 = arith.index_cast %280 : i32 to index
    %c384 = arith.constant 384 : index
    %541 = vector.load %arg7[%540, %c384] : memref<8x640xf32, #tpu.memory_space<vmem>>, vector<8x64xf32>
    tpu.vector_store %arg7[%540, %c384], %525 {strides = array<i32>} : memref<8x640xf32, #tpu.memory_space<vmem>>, vector<8x64xf32>,
    %542 = arith.index_cast %280 : i32 to index
    %c448 = arith.constant 448 : index
    %543 = vector.load %arg7[%542, %c448] : memref<8x640xf32, #tpu.memory_space<vmem>>, vector<8x64xf32>
    tpu.vector_store %arg7[%542, %c448], %527 {strides = array<i32>} : memref<8x640xf32, #tpu.memory_space<vmem>>, vector<8x64xf32>,
    %544 = arith.index_cast %280 : i32 to index
    %c512 = arith.constant 512 : index
    %545 = vector.load %arg7[%544, %c512] : memref<8x640xf32, #tpu.memory_space<vmem>>, vector<8x64xf32>
    tpu.vector_store %arg7[%544, %c512], %529 {strides = array<i32>} : memref<8x640xf32, #tpu.memory_space<vmem>>, vector<8x64xf32>,
    %c1_i32_183 = arith.constant 1 : i32
    %c0_184 = arith.constant 0 : index
    %c0_185 = arith.constant 0 : index
    %546 = vector.load %arg7[%c0_184, %c0_185] : memref<8x640xf32, #tpu.memory_space<vmem>>, vector<8x640xf32>
    %c0_186 = arith.constant 0 : index
    %c0_187 = arith.constant 0 : index
    %547 = vector.load %arg3[%c0_186, %c0_187] : memref<640x128xf32, #tpu.memory_space<vmem>>, vector<640x128xf32>
    %cst_188 = arith.constant dense<0.000000e+00> : vector<8x128xf32>
    %548 = tpu.matmul %546, %547, %cst_188 {dimension_numbers = #tpu.dot_dimension_numbers<[1], [0], [0], [1], [0, 0, 1, 1], [], []>} : vector<8x640xf32>, vector<640x128xf32>, vector<8x128xf32> -> vector<8x128xf32>
    %c0_189 = arith.constant 0 : index
    %c0_190 = arith.constant 0 : index
    %549 = vector.load %arg4[%c0_189, %c0_190] : memref<8x128xf32, #tpu.memory_space<vmem>>, vector<8x128xf32>
    tpu.vector_store %arg4[%c0_189, %c0_190], %548 {strides = array<i32>} : memref<8x128xf32, #tpu.memory_space<vmem>>, vector<8x128xf32>,
    return
  }
  func.func @transform_0(%arg0: i32) -> (i32, i32) {
    %c0_i32 = arith.constant 0 : i32
    %c0_i32_0 = arith.constant 0 : i32
    return %arg0, %c0_i32 : i32, i32
  }
  func.func @transform_1(%arg0: i32) -> (i32, i32) {
    %c0_i32 = arith.constant 0 : i32
    %c0_i32_0 = arith.constant 0 : i32
    %c0_i32_1 = arith.constant 0 : i32
    return %c0_i32, %c0_i32_0 : i32, i32
  }
  func.func @transform_2(%arg0: i32) -> (i32, i32) {
    %c0_i32 = arith.constant 0 : i32
    %c0_i32_0 = arith.constant 0 : i32
    %c0_i32_1 = arith.constant 0 : i32
    return %c0_i32, %c0_i32_0 : i32, i32
  }
  func.func @transform_3(%arg0: i32) -> (i32, i32) {
    %c0_i32 = arith.constant 0 : i32
    %c0_i32_0 = arith.constant 0 : i32
    return %arg0, %c0_i32 : i32, i32
  }
}

</mosaic_0001>

<bundles_post_ra>
// kernel: tpu_custom_call.1
= control target key start
LH: loop header
LB: loop body
LE: loop exit
PB: predicated region body
PF: predicated region fallthrough
CT: control target
= control target key end

     0   :  { %8 = vsyncpa [#allocation6], 0  ;;  %s1773_s0 = inlined_call_operand.hbm [shape: f32[8,32], index: 0, kind: input, shape index: {}]   ;;  %s1774_s1 = inlined_call_operand.hbm [shape: f32[384,128], index: 1, kind: input, shape index: {}]   ;;  %s1775_s2 = inlined_call_operand.hbm [shape: f32[640,128], index: 2, kind: input, shape index: {}]   ;;  %s1776_s3 = inlined_call_operand.hbm [shape: f32[8,128], index: 3, kind: output, shape index: {}]  }
   0x1   :  { %9 = vsyncpa [#allocation9], 0 }
   0x2   :  { %10 = vsyncpa [#allocation7], 0  ;;  %s1456_s12 = smov [#allocation8]   ;;  %s1362_s16 = scalar_lea.hbm %s1774_s1, 6144 }
   0x3   :  { %s26_s13 = sshll.u32 %s1456_s12, 4  ;;  %p1363_p0 = scmp.ne.s32.totalorder %s1774_s1, %s1362_s16  ;;  %s27_s13 = int_to_ptr.vmem [resolvable:$true] %s26_s13 }
   0x4   :  { %p1366_p1 = scmp.lt.u32.totalorder %s1362_s16, %s1774_s1 }
   0x6   :  { %p1368_p2 = pnand %p1366_p1, %p1363_p0 }
   0x8   :  { %1371 = shalt.err (!%p1368_p2)
}
   0x9   :  { %s1372_s21 = scalar_lea.vmem %s27_s13, 6144  ;;  %p1377_p4 = scmp.lt.s32.totalorder %s27_s13, %s27_s13 }
   0xa   :  { %p1373_p3 = scmp.ne.s32.totalorder %s27_s13, %s1372_s21  ;;  %p1378_p5 = scmp.lt.s32.totalorder %s1372_s21, %s1372_s21 }
   0xc   :  { %p1379_p6 = por %p1378_p5, %p1377_p4 }
   0xe   :  { %p1380_p7 = pnand %p1379_p6, %p1373_p3 }
  0x10   :  { %1383 = shalt.err (!%p1380_p7)
}
  0x11   :  { %s1457_s22 = smov 128   ;;  %s1458_s23 = smov 8  }
  0x12   :  { %32 = dma.hbm_to_vmem [thread:$0]  %s1774_s1, 6144, %s27_s13, [#allocation9], %s1457_s22, %s1457_s22, %s1458_s23  }
  0x13   :  { %s1459_s26 = smov [#allocation5]   ;;  %s1460_s28 = smov [#allocation10]  }
  0x14   :  { %s17_s27 = sshll.u32 %s1459_s26, 4  ;;  %s38_s29 = sshll.u32 %s1460_s28, 4  ;;  %s18_s27 = int_to_ptr.vmem [resolvable:$true] %s17_s27  ;;  %s39_s29 = int_to_ptr.vmem [resolvable:$true] %s38_s29 }
  0x15   :  { %s1384_s5 = scalar_lea.hbm %s1773_s0, 128 }
  0x16   :  { %p1385_p8 = scmp.ne.s32.totalorder %s1773_s0, %s1384_s5  ;;  %p1388_p9 = scmp.lt.u32.totalorder %s1384_s5, %s1773_s0 }
  0x18   :  { %p1390_p10 = pnand %p1388_p9, %p1385_p8 }
  0x1a   :  { %1393 = shalt.err (!%p1390_p10)
}
  0x1b   :  { %s1394_s1 = scalar_lea.vmem %s18_s27, 128  ;;  %p1399_p12 = scmp.lt.s32.totalorder %s18_s27, %s18_s27 }
  0x1c   :  { %p1395_p11 = scmp.ne.s32.totalorder %s18_s27, %s1394_s1  ;;  %p1400_p13 = scmp.lt.s32.totalorder %s1394_s1, %s1394_s1 }
  0x1e   :  { %p1401_p0 = por %p1400_p13, %p1399_p12 }
  0x20   :  { %p1402_p1 = pnand %p1401_p0, %p1395_p11 }
  0x22   :  { %1405 = shalt.err (!%p1402_p1)
}
  0x23   :  { %20 = dma.hbm_to_vmem [thread:$0]  %s1773_s0, 128, %s18_s27, [#allocation6]  }
  0x24   :  { %s1406_s14 = scalar_lea.hbm %s1775_s2, 10240 }
  0x25   :  { %p1407_p2 = scmp.ne.s32.totalorder %s1775_s2, %s1406_s14  ;;  %p1410_p3 = scmp.lt.u32.totalorder %s1406_s14, %s1775_s2 }
  0x27   :  { %p1412_p4 = pnand %p1410_p3, %p1407_p2 }
  0x29   :  { %1415 = shalt.err (!%p1412_p4)
}
  0x2a   :  { %s1416_s19 = scalar_lea.vmem %s39_s29, 10240  ;;  %p1421_p6 = scmp.lt.s32.totalorder %s39_s29, %s39_s29 }
  0x2b   :  { %p1417_p5 = scmp.ne.s32.totalorder %s39_s29, %s1416_s19  ;;  %p1422_p7 = scmp.lt.s32.totalorder %s1416_s19, %s1416_s19 }
  0x2d   :  { %p1423_p8 = por %p1422_p7, %p1421_p6 }
  0x2f   :  { %p1424_p9 = pnand %p1423_p8, %p1417_p5 }
  0x31   :  { %1427 = shalt.err (!%p1424_p9)
}
  0x32   :  { %44 = dma.hbm_to_vmem [thread:$0]  %s1775_s2, 10240, %s39_s29, [#allocation9], %s1457_s22, %s1457_s22, %s1458_s23  }
  0x33   :  { %1450 = dma.done.wait [#allocation6], 128  }
  0x34   :  { %1451 = vsyncadd [#allocation6], 4294967168 }
  0x35   :  { %1452 = dma.done.wait [#allocation9], 16384  }
  0x36   :  { %1453 = vsyncadd [#allocation9], 4294950912  ;;  %v1461_v0 = vmov 0.0|0.0   ;;  %vm54_vm0 = vcmask 1047808   ;;  %v1462_v1 = vmov 0.0   ;;  %v1532_v2 = vld [vmem:[#allocation5] sm:$0xff] }
  0x37   :  { %1230 = vmatprep.subr.bf16.mxu1 %v1461_v0  ;;  %55 = vst.msk [vmem:[#allocation2 + $0x10] sm:$0xff] %vm54_vm0, %v1462_v1  ;;  %v283_v3 = vld [vmem:[#allocation8 + $0x80] sm:$0xff]  ;;  %v284_v4 = vld [vmem:[#allocation8 + $0x88] sm:$0xff]  ;;  %vm77_vm1 = vcmp.ge.f32.partialorder %v1532_v2, -0.6  ;;  %vm85_vm5 = vcmp.ge.f32.partialorder %v1532_v2, 1.0 }
  0x38   :  { %vm79_vm2 = vcmp.ge.f32.partialorder %v1532_v2, -0.2  ;;  %vm81_vm3 = vcmp.ge.f32.partialorder %v1532_v2, 0.2  ;;  %v1198_v5 = vpack.c.bf16 %v284_v4, %v283_v3  ;;  %v78_v6 = vsel %vm77_vm1, 1.0, %v1462_v1  ;;  %s1463_s2 = smov 32  }
  0x39   :  { %v80_v7 = vsel %vm79_vm2, 1.0, %v1462_v1  ;;  %v82_v8 = vsel %vm81_vm3, 1.0, %v1462_v1  ;;  %vm83_vm4 = vcmp.ge.f32.partialorder %v1532_v2, 0.6  ;;  %v86_v12 = vsel %vm85_vm5, 1.0, %v1462_v1  ;;  %s1464_s21 = smov 64  }
  0x3a   :  { %v84_v9 = vsel %vm83_vm4, 1.0, %v1462_v1  ;;  %v97_v10 = vsub.f32 %v78_v6, %v80_v7  ;;  %v98_v11 = vsub.f32 %v80_v7, %v82_v8  ;;  %1199 = vmatprep.subr.bf16.mxu0 %v1198_v5  ;;  %v970_v14 = vadd.f32 1.0, %v1532_v2  ;;  %s1465_s22 = smov 96   ;;  %s1467_s23 = smov [#allocation11]  }
  0x3b   :  { %v99_v13 = vsub.f32 %v82_v8, %v84_v9  ;;  %v971_v15 = vadd.f32 0.6, %v1532_v2  ;;  %v100_v16 = vsub.f32 %v84_v9, %v86_v12  ;;  %v972_v17 = vadd.f32 0.2, %v1532_v2  ;;  %s957_s24 = sshll.u32 %s1467_s23, 4  ;;  %s958_s24 = int_to_ptr.vmem [resolvable:$true] %s957_s24 }
  0x3c   :  { %v1548_v18 = vadd.f32 -0.2, %v1532_v2  ;;  %v1551_v19 = vadd.f32 -0.6, %v1532_v2  ;;  %v121_v20 = vmul.f32 2.5, %v970_v14  ;;  %v163_v25 = vmul.f32 1.25, %v970_v14  ;;  %p1433_p11 = scmp.lt.s32.totalorder %s958_s24, %s958_s24 }
  0x3d   :  { %v123_v21 = vmul.f32 2.5, %v971_v15  ;;  %v125_v22 = vmul.f32 2.5, %v972_v17  ;;  %v165_v27 = vmul.f32 1.25, %v971_v15  ;;  %v167_v28 = vmul.f32 1.25, %v972_v17  ;;  %s1428_s25 = scalar_lea.vmem %s958_s24, 128 }
  0x3e   :  { %v127_v23 = vmul.f32 2.5, %v1548_v18  ;;  %v129_v24 = vmul.f32 2.5, %v1551_v19  ;;  %v201_v29 = vmul.f32 0.8333333, %v970_v14  ;;  %v203_v33 = vmul.f32 0.8333333, %v971_v15  ;;  %p1429_p10 = scmp.ne.s32.totalorder %s958_s24, %s1428_s25  ;;  %p1434_p12 = scmp.lt.s32.totalorder %s1428_s25, %s1428_s25 }
  0x3f   :  { %v124_v26 = vmul.f32 %v123_v21, %v97_v10  ;;  %v126_v30 = vmul.f32 %v125_v22, %v98_v11  ;;  %v169_v34 = vmul.f32 1.25, %v1548_v18  ;;  %vm75_vm6 = vcmp.ge.f32.partialorder %v1532_v2, -1.0 }
  0x40   :  { %v128_v31 = vmul.f32 %v127_v23, %v99_v13  ;;  %v130_v32 = vmul.f32 %v129_v24, %v100_v16  ;;  %vm87_vm7 = vcmp.ge.f32.partialorder %v1532_v2, 1.4  ;;  %vm89_vm8 = vcmp.ge.f32.partialorder %v1532_v2, 1.8  ;;  %p1435_p13 = por %p1434_p12, %p1433_p11 }
  0x41   :  { %v145_v35 = vsub.f32 %v98_v11, %v126_v30  ;;  %v76_v38 = vsel %vm75_vm6, 1.0, %v1462_v1  ;;  %v143_v40 = vsub.f32 %v97_v10, %v124_v26  ;;  %v88_v41 = vsel %vm87_vm7, 1.0, %v1462_v1 }
  0x42   :  { %v147_v36 = vsub.f32 %v99_v13, %v128_v31  ;;  %v149_v37 = vsub.f32 %v100_v16, %v130_v32  ;;  %v1560_v39 = vsub.f32 %v76_v38, %v78_v6  ;;  %vm91_vm9 = vcmp.ge.f32.partialorder %v1532_v2, 2.2  ;;  %p1436_p0 = pnand %p1435_p13, %p1429_p10 }
  0x43   :  { %v146_v42 = vadd.f32 %v145_v35, %v124_v26  ;;  %v92_v45 = vsel %vm91_vm9, 1.0, %v1462_v1  ;;  %v205_v46 = vmul.f32 0.8333333, %v972_v17  ;;  %v90_v48 = vsel %vm89_vm8, 1.0, %v1462_v1 }
  0x44   :  { %v148_v43 = vadd.f32 %v147_v36, %v126_v30  ;;  %v150_v44 = vadd.f32 %v149_v37, %v128_v31  ;;  %v1566_v47 = vmul.f32 %v121_v20, %v1560_v39  ;;  %v101_v49 = vsub.f32 %v86_v12, %v88_v41 }
  0x45   :  { %v166_v50 = vmul.f32 %v165_v27, %v146_v42  ;;  %v1570_v53 = vadd.f32 -1.0, %v1532_v2  ;;  %v1575_v55 = vsub.f32 %v90_v48, %v92_v45  ;;  %v977_v56 = vadd.f32 -1.8, %v1532_v2 }
  0x46   :  { %v168_v51 = vmul.f32 %v167_v28, %v148_v43  ;;  %v170_v52 = vmul.f32 %v169_v34, %v150_v44  ;;  %v1573_v54 = vadd.f32 %v143_v40, %v1566_v47  ;;  %v171_v57 = vmul.f32 1.25, %v1551_v19 }
  0x47   :  { %vm67_vm10 = vcmask 261120   ;;  %v183_v60 = vsub.f32 %v146_v42, %v166_v50  ;;  %v131_v61 = vmul.f32 2.5, %v1570_v53  ;;  %v135_v63 = vmul.f32 2.5, %v977_v56  ;;  %v299_v56 = vld [vmem:[#allocation8 + $0x100] sm:$0xff] }
  0x48   :  { %v185_v58 = vsub.f32 %v148_v43, %v168_v51  ;;  %v187_v59 = vsub.f32 %v150_v44, %v170_v52  ;;  %v1581_v62 = vmul.f32 %v163_v25, %v1573_v54  ;;  %vm69_vm11 = vcmp.ge.f32.partialorder %v1532_v2, -2.2  ;;  %v267_v44 = vld [vmem:[#allocation8] sm:$0xff] }
  0x49   :  { %vm71_vm12 = vcmp.ge.f32.partialorder %v1532_v2, -1.8  ;;  %v1585_v5 = vmul.f32 %v131_v61, %v101_v49  ;;  %v70_v6 = vsel %vm69_vm11, 1.0, %v1462_v1  ;;  %v1592_v8 = vmul.f32 %v135_v63, %v1575_v55 }
  0x4a   :  { %v186_v3 = vadd.f32 %v185_v58, %v166_v50  ;;  %v188_v4 = vadd.f32 %v187_v59, %v168_v51  ;;  %v1589_v7 = vadd.f32 %v183_v60, %v1581_v62  ;;  %v72_v9 = vsel %vm71_vm12, 1.0, %v1462_v1 }
  0x4b   :  { %vm73_vm13 = vcmp.ge.f32.partialorder %v1532_v2, -1.4  ;;  %v151_v12 = vsub.f32 %v101_v49, %v1585_v5  ;;  %v1603_v15 = vsub.f32 %v88_v41, %v90_v48  ;;  %v207_v16 = vmul.f32 0.8333333, %v1548_v18 }
  0x4c   :  { %v204_v10 = vmul.f32 %v203_v33, %v186_v3  ;;  %v1596_v11 = vmul.f32 %v205_v46, %v188_v4  ;;  %v74_v13 = vsel %vm73_vm13, 1.0, %v1462_v1  ;;  %v1601_v14 = vmul.f32 %v201_v29, %v1589_v7 }
  0x4d   :  { %v93_v17 = vsub.f32 %v70_v6, %v72_v9  ;;  %v152_v22 = vadd.f32 %v151_v12, %v130_v32  ;;  %v94_v23 = vsub.f32 %v72_v9, %v74_v13  ;;  %v95_v24 = vsub.f32 %v74_v13, %v76_v38  ;;  %v285_v9 = vld [vmem:[#allocation8 + $0x90] sm:$0xff] }
  0x4e   :  { %v221_v20 = vsub.f32 %v188_v4, %v1596_v11  ;;  %v219_v21 = vsub.f32 %v186_v3, %v204_v10  ;;  %v967_v25 = vadd.f32 2.2, %v1532_v2  ;;  %v968_v26 = vadd.f32 1.8, %v1532_v2  ;;  %v269_v12 = vld [vmem:[#allocation8 + $0x10] sm:$0xff] }
  0x4f   :  { %v969_v27 = vadd.f32 1.4, %v1532_v2  ;;  %v155_v30 = vsub.f32 %v1575_v55, %v1592_v8  ;;  %v1613_v18 = vmul.f32 %v171_v57, %v152_v22  ;;  %v141_v32 = vsub.f32 %v1560_v39, %v1566_v47  ;;  %v268_v55 = vld [vmem:[#allocation8 + $0x8] sm:$0xff] }
  0x50   :  { %v222_v28 = vadd.f32 %v221_v20, %v204_v10  ;;  %v220_v29 = vadd.f32 %v219_v21, %v1601_v14  ;;  %v115_v31 = vmul.f32 2.5, %v967_v25  ;;  %v117_v33 = vmul.f32 2.5, %v968_v26  ;;  %v286_v10 = vld [vmem:[#allocation8 + $0x98] sm:$0xff] }
  0x51   :  { %v119_v34 = vmul.f32 2.5, %v969_v27  ;;  %v189_v35 = vsub.f32 %v152_v22, %v1613_v18  ;;  %v157_v36 = vmul.f32 1.25, %v967_v25  ;;  %v159_v37 = vmul.f32 1.25, %v968_v26  ;;  %v270_v21 = vld [vmem:[#allocation8 + $0x18] sm:$0xff] }
  0x52   :  { %249 = vrot.lane.b32.xlu0 %v222_v28, %s1463_s2  ;;  %v181_v38 = vsub.f32 %v1573_v54, %v1581_v62  ;;  %247 = vst.msk [vmem:[#allocation2 + $0x8] sm:$0xff] %vm67_vm10, %v220_v29  ;;  %v116_v40 = vmul.f32 %v115_v31, %v93_v17  ;;  %v118_v41 = vmul.f32 %v117_v33, %v94_v23  ;;  %v161_v43 = vmul.f32 1.25, %v969_v27  ;;  %v300_v54 = vld [vmem:[#allocation8 + $0x108] sm:$0xff]  ;;  %v302_v22 = vld [vmem:[#allocation8 + $0x118] sm:$0xff]  ;;  %v287_v33 = vld [vmem:[#allocation8 + $0xa0] sm:$0xff] }
  0x53   :  { %v120_v42 = vmul.f32 %v119_v34, %v95_v24  ;;  %v190_v45 = vadd.f32 %v189_v35, %v170_v52  ;;  %v1622_v46 = vmul.f32 0.8333333, %v967_v25  ;;  %v197_v39 = vmul.f32 0.8333333, %v968_v26  ;;  %v288_v34 = vld [vmem:[#allocation8 + $0xa8] sm:$0xff]  ;;  %v271_v35 = vld [vmem:[#allocation8 + $0x20] sm:$0xff] }
  0x54   :  { %v976_v47 = vadd.f32 -1.4, %v1532_v2  ;;  %v137_v48 = vsub.f32 %v94_v23, %v118_v41  ;;  %v199_v51 = vmul.f32 0.8333333, %v969_v27  ;;  %v173_v59 = vmul.f32 1.25, %v1570_v53 }
  0x55   :  { %v139_v49 = vsub.f32 %v95_v24, %v120_v42  ;;  %v142_v50 = vadd.f32 %v141_v32, %v120_v42  ;;  %v1625_v57 = vmul.f32 %v207_v16, %v190_v45  ;;  %v1629_v60 = vmul.f32 0.8333333, %v1551_v19  ;;  %v301_v19 = vld [vmem:[#allocation8 + $0x110] sm:$0xff]  ;;  %v304_v42 = vld [vmem:[#allocation8 + $0x128] sm:$0xff] }
  0x56   :  { %v133_v58 = vmul.f32 2.5, %v976_v47  ;;  %v138_v52 = vadd.f32 %v137_v48, %v116_v40  ;;  %v175_v63 = vmul.f32 1.25, %v976_v47  ;;  %v1200_v6 = vpack.c.bf16 %v268_v55, %v267_v44  ;;  %v290_v44 = vld [vmem:[#allocation8 + $0xb8] sm:$0xff]  ;;  %v273_v48 = vld [vmem:[#allocation8 + $0x30] sm:$0xff] }
  0x57   :  { %v140_v61 = vadd.f32 %v139_v49, %v118_v41  ;;  %v162_v62 = vmul.f32 %v161_v43, %v142_v50  ;;  %v223_v3 = vsub.f32 %v190_v45, %v1625_v57  ;;  %v1231_v8 = vpack.c.bf16 %v300_v54, %v299_v56  ;;  %v289_v43 = vld [vmem:[#allocation8 + $0xb0] sm:$0xff]  ;;  %v274_v49 = vld [vmem:[#allocation8 + $0x38] sm:$0xff] }
  0x58   :  { %v134_v4 = vmul.f32 %v133_v58, %v1603_v15  ;;  %v158_v13 = vmul.f32 %v157_v36, %v138_v52  ;;  %v211_v26 = vmul.f32 0.8333333, %v1570_v53  ;;  %1201 = vmatpush3.bf16.msra.mxu0 %v1200_v6  ;;  %v1202_v31 = vpack.c.bf16 %v286_v10, %v285_v9  ;;  %v272_v53 = vld [vmem:[#allocation8 + $0x28] sm:$0xff]  ;;  %v303_v36 = vld [vmem:[#allocation8 + $0x120] sm:$0xff] }
  0x59   :  { %v160_v16 = vmul.f32 %v159_v37, %v140_v61  ;;  %v179_v17 = vsub.f32 %v142_v50, %v162_v62  ;;  %v182_v20 = vadd.f32 %v181_v38, %v162_v62  ;;  %v224_v23 = vadd.f32 %v223_v3, %v1596_v11  ;;  %1232 = vmatpush3.bf16.msra.mxu1 %v1231_v8  ;;  %v292_v62 = vld [vmem:[#allocation8 + $0xc8] sm:$0xff] }
  0x5a   :  { %v153_v24 = vsub.f32 %v1603_v15, %v134_v4  ;;  %v156_v25 = vadd.f32 %v155_v30, %v134_v4  ;;  %1233 = vmatprep.subr.bf16.mxu1 %v1461_v0  ;;  %v1204_v15 = vpack.c.bf16 %v270_v21, %v269_v12  ;;  %v1234_v30 = vpack.c.bf16 %v302_v22, %v301_v19  ;;  %v275_v12 = vld [vmem:[#allocation8 + $0x40] sm:$0xff]  ;;  %v308_v21 = vld [vmem:[#allocation8 + $0x148] sm:$0xff]  ;;  %v294_v19 = vld [vmem:[#allocation8 + $0xd8] sm:$0xff] }
  0x5b   :  { %v177_v27 = vsub.f32 %v140_v61, %v160_v16  ;;  %v180_v28 = vadd.f32 %v179_v17, %v160_v16  ;;  %v200_v29 = vmul.f32 %v199_v51, %v182_v20  ;;  %254 = vrot.lane.b32.xlu1 %v224_v23, %s1464_s21  ;;  %v217_v41 = vsub.f32 %v1589_v7, %v1601_v14  ;;  %v305_v7 = vld [vmem:[#allocation8 + $0x130] sm:$0xff]  ;;  %v306_v14 = vld [vmem:[#allocation8 + $0x138] sm:$0xff]  ;;  %v291_v61 = vld [vmem:[#allocation8 + $0xc0] sm:$0xff] }
  0x5c   :  { %v154_v11 = vadd.f32 %v153_v24, %v1585_v5  ;;  %v176_v32 = vmul.f32 %v175_v63, %v156_v25  ;;  %1203 = vmatprep.subr.bf16.mxu0 %v1202_v31  ;;  %v1206_v5 = vpack.c.bf16 %v288_v34, %v287_v33  ;;  %v57_v50 = vsub.f32 0.0, %v1532_v2  ;;  %v307_v16 = vld [vmem:[#allocation8 + $0x140] sm:$0xff]  ;;  %v310_v31 = vld [vmem:[#allocation8 + $0x158] sm:$0xff]  ;;  %v296_v34 = vld [vmem:[#allocation8 + $0xe8] sm:$0xff] }
  0x5d   :  { %v178_v37 = vadd.f32 %v177_v27, %v158_v13  ;;  %v198_v38 = vmul.f32 %v197_v39, %v180_v28  ;;  %v215_v40 = vsub.f32 %v182_v20, %v200_v29  ;;  %1205 = vmatpush3.bf16.msra.mxu0 %v1204_v15  ;;  %1235 = vmatpush3.bf16.msra.mxu1 %v1234_v30  ;;  %v276_v13 = vld [vmem:[#allocation8 + $0x48] sm:$0xff]  ;;  %v278_v27 = vld [vmem:[#allocation8 + $0x58] sm:$0xff]  ;;  %v295_v33 = vld [vmem:[#allocation8 + $0xe0] sm:$0xff]  ;;  %vm1466_vm14 = vmmov 0  }
  0x5e   :  { %v174_v45 = vmul.f32 %v173_v59, %v154_v11  ;;  %v193_v47 = vsub.f32 %v156_v25, %v176_v32  ;;  %v1208_v56 = vpack.c.bf16 %v272_v53, %v271_v35  ;;  %1236 = vmatprep.subr.bf16.mxu1 %v1461_v0  ;;  %1207 = vmatprep.subr.bf16.mxu0 %v1206_v5  ;;  %v58_v9 = vmul.f32 1.442695, %v57_v50  ;;  %v279_v30 = vld [vmem:[#allocation8 + $0x60] sm:$0xff]  ;;  %v280_v35 = vld [vmem:[#allocation8 + $0x68] sm:$0xff]  ;;  %v314_v5 = vld [vmem:[#allocation8 + $0x178] sm:$0xff] }
  0x5f   :  { %v196_v51 = vmul.f32 %v1622_v46, %v178_v37  ;;  %v213_v39 = vsub.f32 %v180_v28, %v198_v38  ;;  %v216_v55 = vadd.f32 %v215_v40, %v198_v38  ;;  %v1237_v59 = vpack.c.bf16 %v304_v42, %v303_v36  ;;  %v309_v28 = vld [vmem:[#allocation8 + $0x150] sm:$0xff]  ;;  %1160 = vmatprep.mubr.msk.f32.mxu1 %vm1466_vm14, %v1462_v1  ;;  %v311_v53 = vld [vmem:[#allocation8 + $0x160] sm:$0xff]  ;;  %v298_v37 = vld [vmem:[#allocation8 + $0xf8] sm:$0xff] }
  0x60   :  { %v191_v54 = vsub.f32 %v154_v11, %v174_v45  ;;  %v194_v58 = vadd.f32 %v193_v47, %v174_v45  ;;  %v1210_v52 = vpack.c.bf16 %v290_v44, %v289_v43  ;;  %v218_v3 = vadd.f32 %v217_v41, %v200_v29  ;;  %v297_v36 = vld [vmem:[#allocation8 + $0xf0] sm:$0xff]  ;;  %v282_v45 = vld [vmem:[#allocation8 + $0x78] sm:$0xff] }
  0x61   :  { %v214_v63 = vadd.f32 %v213_v39, %v196_v51  ;;  %236 = vrot.lane.b32.xlu1 %v216_v55, %s1464_s21  ;;  %v1212_v4 = vpack.c.bf16 %v274_v49, %v273_v48  ;;  %1209 = vmatpush3.bf16.msra.mxu0 %v1208_v56  ;;  %v1240_v8 = vpack.c.bf16 %v306_v14, %v305_v7  ;;  %1354 = vpow2.f32 %v58_v9  ;;  %v281_v44 = vld [vmem:[#allocation8 + $0x70] sm:$0xff] }
  0x62   :  { %v192_v46 = vadd.f32 %v191_v54, %v1613_v18  ;;  %v212_v6 = vmul.f32 %v211_v26, %v194_v58  ;;  %1238 = vmatpush3.bf16.msra.mxu1 %v1237_v59  ;;  %1211 = vmatprep.subr.bf16.mxu0 %v1210_v52  ;;  %v1214_v10 = vpack.c.bf16 %v292_v62, %v291_v61  ;;  %v293_v18 = vld [vmem:[#allocation8 + $0xd0] sm:$0xff]  ;;  %vm233_vm15 = vcmask 523520   ;;  %v676_v62 = vld [vmem:[#allocation10 + $0x80] sm:$0xff] }
  0x63   :  { %230 = vrot.lane.b32.xlu0 %v214_v63, %s1463_s2  ;;  %1239 = vmatprep.subr.bf16.mxu1 %v1461_v0  ;;  %v1216_v24 = vpack.c.bf16 %v276_v13, %v275_v12  ;;  %v1243_v25 = vpack.c.bf16 %v308_v21, %v307_v16  ;;  %v1218_v26 = vpack.c.bf16 %v294_v19, %v293_v18  ;;  %v313_v47 = vld [vmem:[#allocation8 + $0x170] sm:$0xff]  ;;  %vm239_vm0 = vcmask 785920   ;;  %v677_v63 = vld [vmem:[#allocation10 + $0x88] sm:$0xff]  ;;  %v663_v13 = vld [vmem:[#allocation10 + $0x18] sm:$0xff] }
  0x64   :  { %v210_v17 = vmul.f32 %v1629_v60, %v192_v46  ;;  %v227_v20 = vsub.f32 %v194_v58, %v212_v6  ;;  %v277_v60 = vld [vmem:[#allocation8 + $0x50] sm:$0xff]  ;;  %v1246_v32 = vpack.c.bf16 %v310_v31, %v309_v28  ;;  %v1222_v15 = vpack.c.bf16 %v296_v34, %v295_v33  ;;  %v708_v16 = vld [vmem:[#allocation10 + $0x180] sm:$0xff]  ;;  %v693_v21 = vld [vmem:[#allocation10 + $0x108] sm:$0xff] }
  0x65   :  { %242 = vrot.lane.b32.xlu1 %v218_v3, %s1465_s22  ;;  %1213 = vmatpush3.bf16.msra.mxu0 %v1212_v4  ;;  %v1220_v11 = vpack.c.bf16 %v278_v27, %v277_v60  ;;  %v1224_v40 = vpack.c.bf16 %v280_v35, %v279_v30  ;;  %v1226_v43 = vpack.c.bf16 %v298_v37, %v297_v36  ;;  %vm245_vm1 = vcmask 1048320   ;;  %v660_v3 = vld [vmem:[#allocation10] sm:$0xff]  ;;  %v678_v6 = vld [vmem:[#allocation10 + $0x90] sm:$0xff]  ;;  %v665_v60 = vld [vmem:[#allocation10 + $0x28] sm:$0xff] }
  0x66   :  { %v225_v22 = vsub.f32 %v192_v46, %v210_v17  ;;  %v228_v23 = vadd.f32 %v227_v20, %v210_v17  ;;  %1241 = vmatpush3.bf16.msra.mxu1 %v1240_v8  ;;  %1215 = vmatprep.subr.bf16.mxu0 %v1214_v10  ;;  %v1228_v48 = vpack.c.bf16 %v282_v45, %v281_v44  ;;  %vm456_vm2 = vcmask 1048064   ;;  %v661_v46 = vld [vmem:[#allocation10 + $0x8] sm:$0xff]  ;;  %v679_v8 = vld [vmem:[#allocation10 + $0x98] sm:$0xff]  ;;  %v662_v12 = vld [vmem:[#allocation10 + $0x10] sm:$0xff] }
  0x67   :  { %1242 = vmatprep.subr.bf16.mxu1 %v1461_v0  ;;  %v1252_v49 = vpack.c.bf16 %v314_v5, %v313_v47  ;;  %v1254_v4 = vpack.c.bf16 %v677_v63, %v676_v62  ;;  %457 = vst.msk [vmem:[#allocation4 + $0x20] sm:$0xff] %vm456_vm2, %v1462_v1  ;;  %v1256_v9 = vpack.c.bf16 %v661_v46, %v660_v3  ;;  %v709_v17 = vld [vmem:[#allocation10 + $0x188] sm:$0xff]  ;;  %v692_v20 = vld [vmem:[#allocation10 + $0x100] sm:$0xff]  ;;  %v710_v27 = vld [vmem:[#allocation10 + $0x190] sm:$0xff] }
  0x68   :  { %v226_v29 = vadd.f32 %v225_v22, %v1625_v57  ;;  %263 = vst.msk [vmem:[#allocation2 + $0x10] sm:$0xff] %vm67_vm10, %v228_v23  ;;  %v312_v57 = vld [vmem:[#allocation8 + $0x168] sm:$0xff]  ;;  %v1258_v10 = vpack.c.bf16 %v679_v8, %v678_v6  ;;  %v1260_v18 = vpack.c.bf16 %v663_v13, %v662_v12  ;;  %v1286_v19 = vpack.c.bf16 %v709_v17, %v708_v16  ;;  %v680_v23 = vld [vmem:[#allocation10 + $0xa0] sm:$0xff]  ;;  %v711_v28 = vld [vmem:[#allocation10 + $0x198] sm:$0xff] }
  0x69   :  { %1217 = vmatpush3.bf16.msra.mxu0 %v1216_v24  ;;  %v1249_v42 = vpack.c.bf16 %v312_v57, %v311_v53  ;;  %v1288_v22 = vpack.c.bf16 %v693_v21, %v692_v20  ;;  %v681_v24 = vld [vmem:[#allocation10 + $0xa8] sm:$0xff]  ;;  %v694_v31 = vld [vmem:[#allocation10 + $0x110] sm:$0xff]  ;;  %v695_v33 = vld [vmem:[#allocation10 + $0x118] sm:$0xff] }
  0x6a   :  { %259 = vrot.lane.b32.xlu0 %v226_v29, %s1465_s22  ;;  %1244 = vmatpush3.bf16.msra.mxu1 %v1243_v25  ;;  %v664_v25 = vld [vmem:[#allocation10 + $0x20] sm:$0xff]  ;;  %v1290_v29 = vpack.c.bf16 %v711_v28, %v710_v27  ;;  %v682_v34 = vld [vmem:[#allocation10 + $0xb0] sm:$0xff]  ;;  %v713_v35 = vld [vmem:[#allocation10 + $0x1a8] sm:$0xff] }
  0x6b   :  { %1219 = vmatprep.subr.bf16.mxu0 %v1218_v26  ;;  %1245 = vmatprep.subr.bf16.mxu1 %v1461_v0  ;;  %v1355_v38 = vpop.eup %1354  ;;  %v1262_v26 = vpack.c.bf16 %v681_v24, %v680_v23  ;;  %v712_v30 = vld [vmem:[#allocation10 + $0x1a0] sm:$0xff]  ;;  %v666_v36 = vld [vmem:[#allocation10 + $0x30] sm:$0xff]  ;;  %v667_v37 = vld [vmem:[#allocation10 + $0x38] sm:$0xff] }
  0x6c   :  { %v60_v41 = vadd.f32 1.0, %v1355_v38  ;;  %v696_v53 = vld [vmem:[#allocation10 + $0x120] sm:$0xff]  ;;  %v1294_v38 = vpack.c.bf16 %v713_v35, %v712_v30  ;;  %v715_v45 = vld [vmem:[#allocation10 + $0x1b8] sm:$0xff]  ;;  %v1268_v47 = vpack.c.bf16 %v667_v37, %v666_v36  ;;  %v670_v63 = vld [vmem:[#allocation10 + $0x50] sm:$0xff] }
  0x6d   :  { %1221 = vmatpush3.bf16.msra.mxu0 %v1220_v11  ;;  %v1292_v11 = vpack.c.bf16 %v695_v33, %v694_v31  ;;  %v668_v5 = vld [vmem:[#allocation10 + $0x40] sm:$0xff]  ;;  %v671_v3 = vld [vmem:[#allocation10 + $0x58] sm:$0xff] }
  0x6e   :  { %1247 = vmatpush3.bf16.msra.mxu1 %v1246_v32  ;;  %1223 = vmatprep.subr.bf16.mxu0 %v1222_v15  ;;  %1356 = vrcp.f32 %v60_v41  ;;  %v683_v32 = vld [vmem:[#allocation10 + $0xb8] sm:$0xff]  ;;  %v1264_v15 = vpack.c.bf16 %v665_v60, %v664_v25  ;;  %v684_v41 = vld [vmem:[#allocation10 + $0xc0] sm:$0xff]  ;;  %v1276_v46 = vpack.c.bf16 %v671_v3, %v670_v63 }
  0x6f   :  { %1248 = vmatprep.subr.bf16.mxu1 %v1461_v0  ;;  %v266_v50 = vld [vmem:[#allocation2 + $0x10] sm:$0xff]  ;;  %v1266_v57 = vpack.c.bf16 %v683_v32, %v682_v34 }
  0x71   :  { %1225 = vmatpush3.bf16.msra.mxu0 %v1224_v40  ;;  %v697_v40 = vld [vmem:[#allocation10 + $0x128] sm:$0xff] }
  0x72   :  { %1250 = vmatpush3.bf16.msra.mxu1 %v1249_v42  ;;  %1227 = vmatprep.subr.bf16.mxu0 %v1226_v43  ;;  %v685_v42 = vld [vmem:[#allocation10 + $0xc8] sm:$0xff]  ;;  %v714_v43 = vld [vmem:[#allocation10 + $0x1b0] sm:$0xff]  ;;  %v1296_v44 = vpack.c.bf16 %v697_v40, %v696_v53 }
  0x73   :  { %1251 = vmatprep.subr.bf16.mxu1 %v1461_v0 }
  0x75   :  { %1229 = vmatpush3.bf16.msra.mxu0 %v1228_v48  ;;  %v1298_v48 = vpack.c.bf16 %v715_v45, %v714_v43 }
  0x76   :  { %1253 = vmatpush3.bf16.msra.mxu1 %v1252_v49  ;;  %1255 = vmatprep.subr.bf16.mxu0 %v1254_v4  ;;  %v698_v49 = vld [vmem:[#allocation10 + $0x130] sm:$0xff] }
  0x77   :  { %1287 = vmatprep.subr.bf16.mxu1 %v1286_v19 }
  0x78   :  { %v1357_v51 = vpop.eup %1356 }
  0x79   :  { %1161 = vmatmul.mubr.f32.vlgmr.msra.gmra.mrb[0].mxu1 %v266_v50  ;;  %v63_v39 = vmul.f32 %v1357_v51, %v1532_v2  ;;  %v699_v50 = vld [vmem:[#allocation10 + $0x138] sm:$0xff]  ;;  %v1270_v51 = vpack.c.bf16 %v685_v42, %v684_v41 }
  0x7a   :  { %1289 = vmatpush3.bf16.msra.mxu1 %v1288_v22 }
  0x7b   :  { %68 = vst.msk [vmem:[#allocation2] sm:$0xff] %vm67_vm10, %v63_v39  ;;  %1291 = vmatprep.subr.bf16.mxu1 %v1290_v29  ;;  %v669_v39 = vld [vmem:[#allocation10 + $0x48] sm:$0xff] }
  0x7e   :  { %1293 = vmatpush3.bf16.msra.mxu1 %v1292_v11 }
  0x7f   :  { %1295 = vmatprep.subr.bf16.mxu1 %v1294_v38 }
  0x82   :  { %1297 = vmatpush3.bf16.msra.mxu1 %v1296_v44 }
  0x83   :  { %1299 = vmatprep.subr.bf16.mxu1 %v1298_v48 }
  0xc4   :  { %v250_v55 = vpop.permute.xlu0 %249 }
  0xc5   :  { %252 = vst.msk [vmem:[#allocation2 + $0x8] sm:$0xff] %vm233_vm15, %v250_v55  ;;  %v716_v55 = vld [vmem:[#allocation10 + $0x1c0] sm:$0xff] }
  0xcd   :  { %v255_v56 = vpop.permute.xlu1 %254 }
  0xce   :  { %257 = vst.msk [vmem:[#allocation2 + $0x8] sm:$0xff] %vm239_vm0, %v255_v56  ;;  %v717_v56 = vld [vmem:[#allocation10 + $0x1c8] sm:$0xff] }
  0xd3   :  { %v237_v7 = vpop.permute.xlu1 %236 }
  0xd5   :  { %v231_v14 = vpop.permute.xlu0 %230 }
  0xd6   :  { %234 = vst.msk [vmem:[#allocation2] sm:$0xff] %vm233_vm15, %v231_v14  ;;  %v687_v14 = vld [vmem:[#allocation10 + $0xd8] sm:$0xff]  ;;  %vm469_vm15 = vcmask 523264  }
  0xd7   :  { %240 = vst.msk [vmem:[#allocation2] sm:$0xff] %vm239_vm0, %v237_v7  ;;  %v243_v54 = vpop.permute.xlu1 %242  ;;  %v686_v7 = vld [vmem:[#allocation10 + $0xd0] sm:$0xff] }
  0xd8   :  { %246 = vst.msk [vmem:[#allocation2] sm:$0xff] %vm245_vm1, %v243_v54  ;;  %v1300_v54 = vpack.c.bf16 %v699_v50, %v698_v49  ;;  %v1274_v62 = vpack.c.bf16 %v687_v14, %v686_v7 }
  0xda   :  { %1301 = vmatpush3.bf16.msra.mxu1 %v1300_v54 }
  0xdc   :  { %v260_v58 = vpop.permute.xlu0 %259 }
  0xdd   :  { %262 = vst.msk [vmem:[#allocation2 + $0x8] sm:$0xff] %vm245_vm1, %v260_v58  ;;  %v1272_v58 = vpack.c.bf16 %v669_v39, %v668_v5 }
  0xdf   :  { %v264_v59 = vld [vmem:[#allocation2] sm:$0xff] }
  0xe4   :  { %v265_v52 = vld [vmem:[#allocation2 + $0x8] sm:$0xff] }
  0xe5   :  { %379 = vmatprep.mubr.f32.mxu0 %v265_v52  ;;  %v700_v52 = vld [vmem:[#allocation10 + $0x140] sm:$0xff] }
  0xe6   :  { %380 = vmatmul.mubr.f32.vlgmr.msra.gmra.mrb[0].mxu0 %v264_v59  ;;  %v1302_v59 = vpack.c.bf16 %v717_v56, %v716_v55 }
  0xe7   :  { %1257 = vmatpush3.bf16.msra.mxu0 %v1256_v9 }
  0xe8   :  { %1259 = vmatprep.subr.bf16.mxu0 %v1258_v10  ;;  %1303 = vmatprep.subr.bf16.mxu1 %v1302_v59 }
  0xeb   :  { %1261 = vmatpush3.bf16.msra.mxu0 %v1260_v18 }
  0xec   :  { %1263 = vmatprep.subr.bf16.mxu0 %v1262_v26 }
  0xef   :  { %1265 = vmatpush3.bf16.msra.mxu0 %v1264_v15 }
  0xf0   :  { %1267 = vmatprep.subr.bf16.mxu0 %v1266_v57 }
  0xf3   :  { %1269 = vmatpush3.bf16.msra.mxu0 %v1268_v47 }
  0xf4   :  { %1271 = vmatprep.subr.bf16.mxu0 %v1270_v51 }
  0xf7   :  { %1273 = vmatpush3.bf16.msra.mxu0 %v1272_v58 }
  0xf8   :  { %1275 = vmatprep.subr.bf16.mxu0 %v1274_v62 }
  0xfb   :  { %1277 = vmatpush3.bf16.msra.mxu0 %v1276_v46 }
 0x14c   :  { %v1659_v2 = vpop.f32.mrb[0].mxu1 }
 0x14d   :  { %v1162_v61 = vpop.f32.mrb[1].mxu1 }
 0x14e   :  { %v701_v61 = vld [vmem:[#allocation10 + $0x148] sm:$0xff] }
 0x14f   :  { %v1304_v4 = vpack.c.bf16 %v701_v61, %v700_v52 }
 0x151   :  { %1305 = vmatpush3.bf16.msra.mxu1 %v1304_v4 }
 0x1b9   :  { %v1021_v6 = vpop.f32.mrb[0].mxu0 }
 0x1ba   :  { %v1022_v8 = vpop.f32.mrb[1].mxu0 }
 0x1bb   :  { %v1023_v9 = vadd.f32 %v1022_v8, %v1021_v6 }
 0x1bd   :  { %v1664_v10 = vadd.f32 %v1023_v9, %v1659_v2 }
 0x1bf   :  { %vm475_vm3 = vcmp.ge.f32.partialorder %v1664_v10, -1.4  ;;  %vm477_vm4 = vcmp.ge.f32.partialorder %v1664_v10, -1.0  ;;  %vm479_vm5 = vcmp.ge.f32.partialorder %v1664_v10, -0.6  ;;  %v981_v12 = vadd.f32 1.0, %v1664_v10 }
 0x1c0   :  { %v476_v13 = vsel %vm475_vm3, 1.0, %v1462_v1  ;;  %v478_v16 = vsel %vm477_vm4, 1.0, %v1462_v1  ;;  %v480_v17 = vsel %vm479_vm5, 1.0, %v1462_v1  ;;  %vm481_vm6 = vcmp.ge.f32.partialorder %v1664_v10, -0.2 }
 0x1c1   :  { %v482_v20 = vsel %vm481_vm6, 1.0, %v1462_v1  ;;  %vm483_vm7 = vcmp.ge.f32.partialorder %v1664_v10, 0.2  ;;  %v497_v2 = vsub.f32 %v476_v13, %v478_v16  ;;  %v498_v21 = vsub.f32 %v478_v16, %v480_v17 }
 0x1c2   :  { %v1677_v18 = vsel %vm483_vm7, 1.0, %v1462_v1  ;;  %v499_v19 = vsub.f32 %v480_v17, %v482_v20  ;;  %v980_v22 = vadd.f32 1.4, %v1664_v10  ;;  %v1681_v23 = vadd.f32 0.6, %v1664_v10 }
 0x1c3   :  { %v500_v24 = vsub.f32 %v482_v20, %v1677_v18  ;;  %v1685_v25 = vadd.f32 0.2, %v1664_v10  ;;  %v523_v26 = vmul.f32 2.5, %v981_v12  ;;  %v565_v60 = vmul.f32 1.25, %v981_v12 }
 0x1c4   :  { %v521_v27 = vmul.f32 2.5, %v980_v22  ;;  %v525_v28 = vmul.f32 2.5, %v1681_v23  ;;  %v563_v29 = vmul.f32 1.25, %v980_v22  ;;  %v567_v31 = vmul.f32 1.25, %v1681_v23 }
 0x1c5   :  { %v524_v33 = vmul.f32 %v523_v26, %v498_v21  ;;  %v527_v34 = vmul.f32 2.5, %v1685_v25  ;;  %v601_v11 = vmul.f32 0.8333333, %v980_v22  ;;  %v603_v32 = vmul.f32 0.8333333, %v981_v12 }
 0x1c6   :  { %v522_v15 = vmul.f32 %v521_v27, %v497_v2  ;;  %v526_v30 = vmul.f32 %v525_v28, %v499_v19  ;;  %vm471_vm8 = vcmp.ge.f32.partialorder %v1664_v10, -2.2  ;;  %vm473_vm9 = vcmp.ge.f32.partialorder %v1664_v10, -1.8 }
 0x1c7   :  { %v1692_v35 = vmul.f32 %v527_v34, %v500_v24  ;;  %v543_v53 = vsub.f32 %v498_v21, %v524_v33  ;;  %v472_v57 = vsel %vm471_vm8, 1.0, %v1462_v1  ;;  %v474_v36 = vsel %vm473_vm9, 1.0, %v1462_v1 }
 0x1c8   :  { %v545_v37 = vsub.f32 %v499_v19, %v526_v30  ;;  %v495_v38 = vsub.f32 %v472_v57, %v474_v36  ;;  %v496_v40 = vsub.f32 %v474_v36, %v476_v13  ;;  %v978_v41 = vadd.f32 2.2, %v1664_v10 }
 0x1c9   :  { %v544_v42 = vadd.f32 %v543_v53, %v522_v15  ;;  %v547_v43 = vsub.f32 %v500_v24, %v1692_v35  ;;  %v979_v44 = vadd.f32 1.8, %v1664_v10  ;;  %v541_v45 = vsub.f32 %v497_v2, %v522_v15 }
 0x1ca   :  { %v546_v47 = vadd.f32 %v545_v37, %v524_v33  ;;  %v517_v5 = vmul.f32 2.5, %v978_v41  ;;  %v559_v48 = vmul.f32 1.25, %v978_v41  ;;  %v597_v49 = vmul.f32 0.8333333, %v978_v41 }
 0x1cb   :  { %v548_v50 = vadd.f32 %v547_v43, %v526_v30  ;;  %v564_v51 = vmul.f32 %v563_v29, %v544_v42  ;;  %v519_v39 = vmul.f32 2.5, %v979_v44  ;;  %v561_v55 = vmul.f32 1.25, %v979_v44 }
 0x1cc   :  { %v566_v56 = vmul.f32 %v565_v60, %v546_v47  ;;  %v518_v7 = vmul.f32 %v517_v5, %v495_v38  ;;  %v599_v14 = vmul.f32 0.8333333, %v979_v44  ;;  %vm485_vm10 = vcmp.ge.f32.partialorder %v1664_v10, 0.6 }
 0x1cd   :  { %v1700_v54 = vmul.f32 %v567_v31, %v548_v50  ;;  %v520_v58 = vmul.f32 %v519_v39, %v496_v40  ;;  %v581_v59 = vsub.f32 %v544_v42, %v564_v51  ;;  %v486_v52 = vsel %vm485_vm10, 1.0, %v1462_v1 }
 0x1ce   :  { %v583_v61 = vsub.f32 %v546_v47, %v566_v56  ;;  %vm487_vm11 = vcmp.ge.f32.partialorder %v1664_v10, 1.0  ;;  %vm489_vm12 = vcmp.ge.f32.partialorder %v1664_v10, 1.4  ;;  %vm491_vm13 = vcmp.ge.f32.partialorder %v1664_v10, 1.8 }
 0x1cf   :  { %v585_v62 = vsub.f32 %v548_v50, %v1700_v54  ;;  %v539_v63 = vsub.f32 %v496_v40, %v520_v58  ;;  %v542_v3 = vadd.f32 %v541_v45, %v520_v58  ;;  %v488_v4 = vsel %vm487_vm11, 1.0, %v1462_v1 }
 0x1d0   :  { %v584_v46 = vadd.f32 %v583_v61, %v564_v51  ;;  %v490_v6 = vsel %vm489_vm12, 1.0, %v1462_v1  ;;  %v492_v8 = vsel %vm491_vm13, 1.0, %v1462_v1  ;;  %vm493_vm0 = vcmp.ge.f32.partialorder %v1664_v10, 2.2  ;;  %v689_v61 = vld [vmem:[#allocation10 + $0xe8] sm:$0xff] }
 0x1d1   :  { %v586_v9 = vadd.f32 %v585_v62, %v566_v56  ;;  %v540_v12 = vadd.f32 %v539_v63, %v518_v7  ;;  %v562_v13 = vmul.f32 %v561_v55, %v542_v3  ;;  %v494_v16 = vsel %vm493_vm0, 1.0, %v1462_v1 }
 0x1d2   :  { %v602_v17 = vmul.f32 %v601_v11, %v584_v46  ;;  %v501_v20 = vsub.f32 %v1677_v18, %v486_v52  ;;  %v502_v2 = vsub.f32 %v486_v52, %v488_v4  ;;  %v503_v21 = vsub.f32 %v488_v4, %v490_v6  ;;  %v688_v52 = vld [vmem:[#allocation10 + $0xe0] sm:$0xff] }
 0x1d3   :  { %v1713_v19 = vmul.f32 %v603_v32, %v586_v9  ;;  %v560_v22 = vmul.f32 %v559_v48, %v540_v12  ;;  %v579_v24 = vsub.f32 %v542_v3, %v562_v13  ;;  %v582_v26 = vadd.f32 %v581_v59, %v562_v13 }
 0x1d4   :  { %v617_v60 = vsub.f32 %v584_v46, %v602_v17  ;;  %v504_v27 = vsub.f32 %v490_v6, %v492_v8  ;;  %v505_v28 = vsub.f32 %v492_v8, %v494_v16  ;;  %v984_v29 = vadd.f32 -0.2, %v1664_v10  ;;  %v672_v46 = vld [vmem:[#allocation10 + $0x60] sm:$0xff]  ;;  %v673_v6 = vld [vmem:[#allocation10 + $0x68] sm:$0xff]  ;;  %v718_v16 = vld [vmem:[#allocation10 + $0x1d0] sm:$0xff] }
 0x1d5   :  { %v619_v31 = vsub.f32 %v586_v9, %v1713_v19  ;;  %v580_v33 = vadd.f32 %v579_v24, %v560_v22  ;;  %v600_v34 = vmul.f32 %v599_v14, %v582_v26  ;;  %v985_v11 = vadd.f32 -0.6, %v1664_v10 }
 0x1d6   :  { %v986_v18 = vadd.f32 -1.0, %v1664_v10  ;;  %v987_v15 = vadd.f32 -1.4, %v1664_v10  ;;  %v988_v32 = vadd.f32 -1.8, %v1664_v10  ;;  %v529_v30 = vmul.f32 2.5, %v984_v29 }
 0x1d7   :  { %v620_v53 = vadd.f32 %v619_v31, %v602_v17  ;;  %v598_v57 = vmul.f32 %v597_v49, %v580_v33  ;;  %v615_v36 = vsub.f32 %v582_v26, %v600_v34  ;;  %v618_v37 = vadd.f32 %v617_v60, %v600_v34  ;;  %v719_v17 = vld [vmem:[#allocation10 + $0x1d8] sm:$0xff] }
 0x1d8   :  { %v530_v38 = vmul.f32 %v529_v30, %v501_v20  ;;  %v531_v40 = vmul.f32 2.5, %v985_v11  ;;  %v533_v41 = vmul.f32 2.5, %v986_v18  ;;  %v535_v42 = vmul.f32 2.5, %v987_v15  ;;  %v703_v26 = vld [vmem:[#allocation10 + $0x158] sm:$0xff] }
 0x1d9   :  { %638 = vrot.lane.b32.xlu0 %v620_v53, %s1464_s21  ;;  %v616_v43 = vadd.f32 %v615_v36, %v598_v57  ;;  %v537_v44 = vmul.f32 2.5, %v988_v32  ;;  %v571_v45 = vmul.f32 1.25, %v984_v29  ;;  %v573_v47 = vmul.f32 1.25, %v985_v11  ;;  %636 = vst.msk [vmem:[#allocation4 + $0x8] sm:$0xff] %vm469_vm15, %v618_v37  ;;  %v691_v31 = vld [vmem:[#allocation10 + $0xf8] sm:$0xff]  ;;  %v720_v32 = vld [vmem:[#allocation10 + $0x1e0] sm:$0xff] }
 0x1da   :  { %v532_v5 = vmul.f32 %v531_v40, %v502_v2  ;;  %v534_v48 = vmul.f32 %v533_v41, %v503_v21  ;;  %v536_v50 = vmul.f32 %v535_v42, %v504_v27  ;;  %v575_v51 = vmul.f32 1.25, %v986_v18  ;;  %v721_v36 = vld [vmem:[#allocation10 + $0x1e8] sm:$0xff]  ;;  %v704_v37 = vld [vmem:[#allocation10 + $0x160] sm:$0xff] }
 0x1db   :  { %632 = vrot.lane.b32.xlu1 %v616_v43, %s1464_s21  ;;  %v538_v49 = vmul.f32 %v537_v44, %v505_v28  ;;  %v577_v39 = vmul.f32 1.25, %v987_v15  ;;  %v1724_v55 = vmul.f32 0.8333333, %v984_v29  ;;  %v1726_v56 = vmul.f32 0.8333333, %v985_v11  ;;  %v690_v29 = vld [vmem:[#allocation10 + $0xf0] sm:$0xff] }
 0x1dc   :  { %v551_v7 = vsub.f32 %v502_v2, %v532_v5  ;;  %v553_v14 = vsub.f32 %v503_v21, %v534_v48  ;;  %v555_v58 = vsub.f32 %v504_v27, %v536_v50  ;;  %v1728_v59 = vmul.f32 0.8333333, %v986_v18  ;;  %v674_v18 = vld [vmem:[#allocation10 + $0x70] sm:$0xff]  ;;  %v675_v15 = vld [vmem:[#allocation10 + $0x78] sm:$0xff] }
 0x1dd   :  { %v557_v62 = vsub.f32 %v505_v28, %v538_v49  ;;  %v549_v63 = vsub.f32 %v501_v20, %v530_v38  ;;  %v569_v3 = vmul.f32 1.25, %v1685_v25  ;;  %v605_v4 = vmul.f32 0.8333333, %v1681_v23  ;;  %v702_v20 = vld [vmem:[#allocation10 + $0x150] sm:$0xff]  ;;  %v723_v44 = vld [vmem:[#allocation10 + $0x1f8] sm:$0xff] }
 0x1de   :  { %v552_v8 = vadd.f32 %v551_v7, %v530_v38  ;;  %v554_v9 = vadd.f32 %v553_v14, %v532_v5  ;;  %v556_v12 = vadd.f32 %v555_v58, %v534_v48  ;;  %v607_v13 = vmul.f32 0.8333333, %v1685_v25  ;;  %v705_v38 = vld [vmem:[#allocation10 + $0x168] sm:$0xff]  ;;  %v722_v43 = vld [vmem:[#allocation10 + $0x1f0] sm:$0xff] }
 0x1df   :  { %v558_v2 = vadd.f32 %v557_v62, %v536_v50  ;;  %v550_v21 = vadd.f32 %v549_v63, %v1692_v35  ;;  %v459_v22 = vsub.f32 0.0, %v1664_v10  ;;  %v1278_v24 = vpack.c.bf16 %v689_v61, %v688_v52  ;;  %v706_v61 = vld [vmem:[#allocation10 + $0x170] sm:$0xff]  ;;  %v707_v62 = vld [vmem:[#allocation10 + $0x178] sm:$0xff] }
 0x1e0   :  { %v572_v60 = vmul.f32 %v571_v45, %v552_v8  ;;  %v574_v27 = vmul.f32 %v573_v47, %v554_v9  ;;  %v576_v23 = vmul.f32 %v575_v51, %v556_v12  ;;  %v1280_v28 = vpack.c.bf16 %v673_v6, %v672_v46 }
 0x1e1   :  { %v578_v33 = vmul.f32 %v577_v39, %v558_v2  ;;  %v570_v34 = vmul.f32 %v569_v3, %v550_v21  ;;  %v460_v11 = vmul.f32 1.442695, %v459_v22  ;;  %1279 = vmatprep.subr.bf16.mxu0 %v1278_v24  ;;  %v1306_v25 = vpack.c.bf16 %v719_v17, %v718_v16  ;;  %v724_v24 = vld [vmem:[#allocation10 + $0x200] sm:$0xff] }
 0x1e2   :  { %v591_v35 = vsub.f32 %v554_v9, %v574_v27  ;;  %v593_v30 = vsub.f32 %v556_v12, %v576_v23  ;;  %v589_v53 = vsub.f32 %v552_v8, %v572_v60  ;;  %1281 = vmatpush3.bf16.msra.mxu0 %v1280_v28  ;;  %v1308_v57 = vpack.c.bf16 %v703_v26, %v702_v20  ;;  %v725_v20 = vld [vmem:[#allocation10 + $0x208] sm:$0xff] }
 0x1e3   :  { %v595_v40 = vsub.f32 %v558_v2, %v578_v33  ;;  %v587_v41 = vsub.f32 %v550_v21, %v570_v34  ;;  %1358 = vpow2.f32 %v460_v11  ;;  %1307 = vmatprep.subr.bf16.mxu1 %v1306_v25  ;;  %v1282_v42 = vpack.c.bf16 %v691_v31, %v690_v29  ;;  %v729_v31 = vld [vmem:[#allocation10 + $0x228] sm:$0xff]  ;;  %v731_v11 = vld [vmem:[#allocation10 + $0x238] sm:$0xff] }
 0x1e4   :  { %v592_v45 = vadd.f32 %v591_v35, %v572_v60  ;;  %v594_v47 = vadd.f32 %v593_v30, %v574_v27  ;;  %v590_v5 = vadd.f32 %v589_v53, %v570_v34  ;;  %1309 = vmatpush3.bf16.msra.mxu1 %v1308_v57  ;;  %v1284_v48 = vpack.c.bf16 %v675_v15, %v674_v18  ;;  %v726_v27 = vld [vmem:[#allocation10 + $0x210] sm:$0xff]  ;;  %v735_v53 = vld [vmem:[#allocation10 + $0x258] sm:$0xff] }
 0x1e5   :  { %v596_v50 = vadd.f32 %v595_v40, %v576_v23  ;;  %v588_v51 = vadd.f32 %v587_v41, %v1700_v54  ;;  %1283 = vmatprep.subr.bf16.mxu0 %v1282_v42  ;;  %v1310_v49 = vpack.c.bf16 %v721_v36, %v720_v32  ;;  %v1312_v39 = vpack.c.bf16 %v705_v38, %v704_v37  ;;  %v727_v23 = vld [vmem:[#allocation10 + $0x218] sm:$0xff]  ;;  %v730_v34 = vld [vmem:[#allocation10 + $0x230] sm:$0xff]  ;;  %v733_v32 = vld [vmem:[#allocation10 + $0x248] sm:$0xff] }
 0x1e6   :  { %v610_v7 = vmul.f32 %v1724_v55, %v592_v45  ;;  %v612_v14 = vmul.f32 %v1726_v56, %v594_v47  ;;  %v608_v58 = vmul.f32 %v607_v13, %v590_v5  ;;  %1285 = vmatpush3.bf16.msra.mxu0 %v1284_v48  ;;  %v1314_v52 = vpack.c.bf16 %v723_v44, %v722_v43  ;;  %v734_v30 = vld [vmem:[#allocation10 + $0x250] sm:$0xff]  ;;  %v736_v38 = vld [vmem:[#allocation10 + $0x260] sm:$0xff]  ;;  %v737_v40 = vld [vmem:[#allocation10 + $0x268] sm:$0xff] }
 0x1e7   :  { %v614_v63 = vmul.f32 %v1728_v59, %v596_v50  ;;  %v606_v3 = vmul.f32 %v605_v4, %v588_v51  ;;  %1311 = vmatprep.subr.bf16.mxu1 %v1310_v49  ;;  %1318 = vmatprep.subr.bf16.mxu0 %v1461_v0  ;;  %v1316_v55 = vpack.c.bf16 %v707_v62, %v706_v61  ;;  %v738_v42 = vld [vmem:[#allocation10 + $0x270] sm:$0xff]  ;;  %v739_v43 = vld [vmem:[#allocation10 + $0x278] sm:$0xff] }
 0x1e8   :  { %v625_v46 = vsub.f32 %v592_v45, %v610_v7  ;;  %v627_v54 = vsub.f32 %v594_v47, %v612_v14  ;;  %v623_v6 = vsub.f32 %v590_v5, %v608_v58  ;;  %1313 = vmatpush3.bf16.msra.mxu1 %v1312_v39  ;;  %v1319_v60 = vpack.c.bf16 %v725_v20, %v724_v24 }
 0x1e9   :  { %v629_v8 = vsub.f32 %v596_v50, %v614_v63  ;;  %v621_v9 = vsub.f32 %v588_v51, %v606_v3  ;;  %1315 = vmatprep.subr.bf16.mxu1 %v1314_v52  ;;  %v1322_v29 = vpack.c.bf16 %v727_v23, %v726_v27  ;;  %v1328_v15 = vpack.c.bf16 %v731_v11, %v730_v34 }
 0x1ea   :  { %v628_v56 = vadd.f32 %v627_v54, %v610_v7  ;;  %v624_v12 = vadd.f32 %v623_v6, %v606_v3  ;;  %v626_v13 = vadd.f32 %v625_v46, %v608_v58  ;;  %v1334_v37 = vpack.c.bf16 %v735_v53, %v734_v30 }
 0x1eb   :  { %v630_v16 = vadd.f32 %v629_v8, %v612_v14  ;;  %v622_v17 = vadd.f32 %v621_v9, %v1713_v19  ;;  %v1337_v41 = vpack.c.bf16 %v737_v40, %v736_v38  ;;  %v1340_v44 = vpack.c.bf16 %v739_v43, %v738_v42 }
 0x1ec   :  { %650 = vrot.lane.b32.xlu0 %v628_v56, %s1464_s21  ;;  %644 = vrot.lane.b32.xlu1 %v624_v12, %s1464_s21  ;;  %648 = vst.msk [vmem:[#allocation4 + $0x18] sm:$0xff] %vm469_vm15, %v626_v13 }
 0x1ed   :  { %v1359_v59 = vpop.eup %1358  ;;  %654 = vst.msk [vmem:[#allocation4 + $0x20] sm:$0xff] %vm469_vm15, %v630_v16  ;;  %642 = vst.msk [vmem:[#allocation4 + $0x10] sm:$0xff] %vm469_vm15, %v622_v17  ;;  %1317 = vmatpush3.bf16.msra.mxu1 %v1316_v55 }
 0x1ee   :  { %v462_v4 = vadd.f32 1.0, %v1359_v59 }
 0x1f0   :  { %1360 = vrcp.f32 %v462_v4 }
 0x1f4   :  { %v659_v45 = vld [vmem:[#allocation4 + $0x20] sm:$0xff] }
 0x1fa   :  { %v1361_v2 = vpop.eup %1360 }
 0x1fb   :  { %v465_v21 = vmul.f32 %v1361_v2, %v1664_v10  ;;  %v728_v10 = vld [vmem:[#allocation10 + $0x220] sm:$0xff] }
 0x1fc   :  { %v1325_v33 = vpack.c.bf16 %v729_v31, %v728_v10 }
 0x1fd   :  { %470 = vst.msk [vmem:[#allocation4] sm:$0xff] %vm469_vm15, %v465_v21 }
 0x24b   :  { %v639_v19 = vpop.permute.xlu0 %638 }
 0x24c   :  { %641 = vst.msk [vmem:[#allocation4 + $0x8] sm:$0xff] %vm456_vm2, %v639_v19 }
 0x24d   :  { %v633_v22 = vpop.permute.xlu1 %632 }
 0x24e   :  { %635 = vst.msk [vmem:[#allocation4] sm:$0xff] %vm456_vm2, %v633_v22 }
 0x253   :  { %v656_v26 = vld [vmem:[#allocation4 + $0x8] sm:$0xff] }
 0x254   :  { %804 = vmatprep.mubr.f32.mxu0 %v656_v26 }
 0x255   :  { %v655_v28 = vld [vmem:[#allocation4] sm:$0xff] }
 0x256   :  { %805 = vmatmul.mubr.f32.vlgmr.msra.gmra.mrb[2].mxu0 %v655_v28 }
 0x257   :  { %1320 = vmatpush3.bf16.msra.mxu0 %v1319_v60  ;;  %1195 = vmatprep.mubr.msk.f32.mxu0 %vm1466_vm14, %v1462_v1  ;;  %v732_v1 = vld [vmem:[#allocation10 + $0x240] sm:$0xff] }
 0x258   :  { %1321 = vmatprep.subr.bf16.mxu0 %v1461_v0  ;;  %v1331_v35 = vpack.c.bf16 %v733_v32, %v732_v1 }
 0x25b   :  { %1323 = vmatpush3.bf16.msra.mxu0 %v1322_v29 }
 0x25c   :  { %1324 = vmatprep.subr.bf16.mxu0 %v1461_v0 }
 0x25e   :  { %v651_v25 = vpop.permute.xlu0 %650  ;;  %v645_v18 = vpop.permute.xlu1 %644 }
 0x25f   :  { %653 = vst.msk [vmem:[#allocation4 + $0x18] sm:$0xff] %vm456_vm2, %v651_v25  ;;  %647 = vst.msk [vmem:[#allocation4 + $0x10] sm:$0xff] %vm456_vm2, %v645_v18  ;;  %1326 = vmatpush3.bf16.msra.mxu0 %v1325_v33 }
 0x260   :  { %1327 = vmatprep.subr.bf16.mxu0 %v1461_v0 }
 0x263   :  { %1329 = vmatpush3.bf16.msra.mxu0 %v1328_v15 }
 0x264   :  { %1330 = vmatprep.subr.bf16.mxu0 %v1461_v0 }
 0x266   :  { %v658_v57 = vld [vmem:[#allocation4 + $0x18] sm:$0xff]  ;;  %v657_v36 = vld [vmem:[#allocation4 + $0x10] sm:$0xff] }
 0x267   :  { %874 = vmatprep.mubr.f32.mxu1 %v658_v57  ;;  %1332 = vmatpush3.bf16.msra.mxu0 %v1331_v35 }
 0x268   :  { %875 = vmatmul.mubr.f32.vlgmr.msra.gmra.mrb[2].mxu1 %v657_v36  ;;  %1333 = vmatprep.subr.bf16.mxu0 %v1461_v0 }
 0x26b   :  { %1335 = vmatpush3.bf16.msra.mxu0 %v1334_v37 }
 0x26c   :  { %1336 = vmatprep.subr.bf16.mxu0 %v1461_v0 }
 0x26f   :  { %1338 = vmatpush3.bf16.msra.mxu0 %v1337_v41 }
 0x270   :  { %1339 = vmatprep.subr.bf16.mxu0 %v1461_v0 }
 0x273   :  { %1341 = vmatpush3.bf16.msra.mxu0 %v1340_v44 }
 0x276   :  { %1196 = vmatmul.mubr.f32.vlgmr.msra.gmra.mrb[4].mxu0 %v659_v45 }
 0x329   :  { %v1073_v47 = vpop.f32.mrb[2].mxu0 }
 0x32a   :  { %v1074_v5 = vpop.f32.mrb[3].mxu0 }
 0x32b   :  { %v1075_v48 = vadd.f32 %v1074_v5, %v1073_v47 }
 0x33b   :  { %v1108_v50 = vpop.f32.mrb[2].mxu1 }
 0x33c   :  { %v1109_v51 = vpop.f32.mrb[3].mxu1 }
 0x33d   :  { %v1110_v49 = vadd.f32 %v1109_v51, %v1108_v50 }
 0x33f   :  { %v877_v39 = vadd.f32 %v1110_v49, %v1075_v48 }
 0x349   :  { %v946_v7 = vpop.f32.mrb[4].mxu0 }
 0x34a   :  { %v947_v14 = vadd.f32 %v946_v7, %v877_v39  ;;  %v1197_v58 = vpop.f32.mrb[5].mxu0 }
 0x34c   :  { %950 = vst [vmem:[#allocation11] sm:$0xff] %v947_v14 }
 0x34d   :  { %1439 = shalt.err (!%p1436_p0)
}
 0x34e   :  { %s1440_s28 = scalar_lea.hbm %s1776_s3, 128 }
 0x34f   :  { %p1441_p1 = scmp.ne.s32.totalorder %s1776_s3, %s1440_s28  ;;  %p1444_p2 = scmp.lt.u32.totalorder %s1440_s28, %s1776_s3 }
 0x351   :  { %p1446_p3 = pnand %p1444_p2, %p1441_p1 }
 0x353   :  { %1449 = shalt.err (!%p1446_p3)
}
 0x354   :  { %960 = dma.vmem_to_hbm [thread:$0]  %s958_s24, 128, %s1776_s3, [#allocation7]  }
 0x355   :  { %1454 = dma.done.wait [#allocation7], 128  }
 0x356   :  { %1455 = vsyncadd [#allocation7], 4294967168 }
 0x357   :  { %964 = vsyncpa [#allocation6], 1 }
 0x358   :  { %965 = vsyncpa [#allocation9], 1 }
 0x359   :  { %966 = vsyncpa [#allocation7], 1 }

</bundles_post_ra>
